<compile_context>
chip_gen: v7x
topology: tpu7x:2x2x1
jax: 0.10.0
libtpu: 0.0.40
codegen_flags: <defaults>
</compile_context>

<pallas_src>
import jax
import jax.numpy as jnp
from jax import lax
from jax.experimental import pallas as pl
from jax.experimental.pallas import tpu as pltpu


_MXU_DTYPE = jnp.bfloat16            # matmul operand dtype; carries, gate math and HBM
                                     # activations stay fp32.
_VMEM_LIMIT_BYTES = 32 * 1024 * 1024


def _pick_time_chunk(seq_len, target=8):
    """Largest divisor of seq_len that is <= target.

    In production `target` should be derived from a VMEM budget: double-buffered
    per-chunk traffic of the recurrent kernel is ~2 * t_chunk * B * (2*4H + 2*H) * 4 bytes
    (keep well under the 64 MiB VMEM of v7x / 128 MiB of v5e-v6e).
    """
    for tc in range(min(seq_len, target), 0, -1):
        if seq_len % tc == 0:
            return tc
    return 1


# ---------------------------------------------------------------------------
# Kernel 1: input-gate projection for BOTH directions of one layer.
#   x blocks : (Tc, B, F) fp32, one per input stream (layer 0: 1 stream = embedding;
#              layer > 0: 2 streams = previous layer's fwd / bwd hidden states)
#   w_ref    : (S, F, 8H) bf16, columns = [fwd i,f,g,o | bwd i,f,g,o]
#   b_ref    : (1, 8H)    fp32, b_ih + b_hh folded, both directions
#   gxf_ref  : (Tc, B, 4H) fp32 forward-direction gate pre-activations
#   gxb_ref  : (Tc, B, 4H) fp32 backward-direction gate pre-activations
# ---------------------------------------------------------------------------
def _gate_proj_body(x_blocks, w_ref, b_ref, gxf_ref, gxb_ref):
    t_chunk, batch, g4 = gxf_ref.shape
    acc = None
    for s, xb in enumerate(x_blocks):
        feat = xb.shape[-1]
        # (Tc, B, F) -> (Tc*B, F): merges non-minor dims (B multiple of 8) -> free.
        xs = xb.reshape(t_chunk * batch, feat).astype(w_ref.dtype)
        part = jnp.dot(xs, w_ref[s], preferred_element_type=jnp.float32)
        acc = part if acc is None else acc + part
    acc = acc + b_ref[...]                       # bias added once per chunk, not per step
    # 4H column split sits on a lane-tile boundary when H is a multiple of 32.
    gxf_ref[...] = acc[:, :g4].reshape(t_chunk, batch, g4)
    gxb_ref[...] = acc[:, g4:].reshape(t_chunk, batch, g4)


def _gate_proj_kernel_1(x0_ref, w_ref, b_ref, gxf_ref, gxb_ref):
    _gate_proj_body((x0_ref[...],), w_ref, b_ref, gxf_ref, gxb_ref)


def _gate_proj_kernel_2(x0_ref, x1_ref, w_ref, b_ref, gxf_ref, gxb_ref):
    _gate_proj_body((x0_ref[...], x1_ref[...]), w_ref, b_ref, gxf_ref, gxb_ref)


# ---------------------------------------------------------------------------
# Kernel 2: the recurrence. One time chunk per grid step; both directions interleaved.
#   gxf_ref : (Tc, B, 4H) fp32 pre-activations, forward chunk  c
#   gxb_ref : (Tc, B, 4H) fp32 pre-activations, backward chunk nc-1-c
#   whh_ref : (2, H, 4H)  bf16 (W_hh^T per direction)
#   yf_ref  : (Tc, B, H)  fp32 forward hidden states (original time order)
#   yb_ref  : (Tc, B, H)  fp32 backward hidden states (original time order)
#   h_scr, c_scr : (2, B, H) fp32, persistent across chunks
# ---------------------------------------------------------------------------
def _lstm_rec_kernel(gxf_ref, gxb_ref, whh_ref, yf_ref, yb_ref, h_scr, c_scr):
    t_chunk, _, g4 = gxf_ref.shape
    hid = g4 // 4

    @pl.when(pl.program_id(0) == 0)
    def _():
        h_scr[...] = jnp.zeros_like(h_scr)
        c_scr[...] = jnp.zeros_like(c_scr)

    w_f = whh_ref[0]                  # (H, 4H) bf16, hoisted out of the step loop
    w_b = whh_ref[1]

    def cell(gates, c_prev):
        # PyTorch gate order (i, f, g, o); fp32 elementwise / EUP math.
        i_g = jax.nn.sigmoid(gates[:, 0 * hid:1 * hid])
        f_g = jax.nn.sigmoid(gates[:, 1 * hid:2 * hid])
        g_g = jnp.tanh(gates[:, 2 * hid:3 * hid])
        o_g = jax.nn.sigmoid(gates[:, 3 * hid:4 * hid])
        c_new = f_g * c_prev + i_g * g_g
        h_new = o_g * jnp.tanh(c_new)
        return h_new, c_new

    def step(s, carry):
        hf, cf, hb, cb = carry                       # live in vregs, no scratch traffic
        tb = t_chunk - 1 - s                         # backward walks its chunk in reverse
        gf = gxf_ref[s] + jnp.dot(hf.astype(w_f.dtype), w_f,
                                  preferred_element_type=jnp.float32)
        gb = gxb_ref[tb] + jnp.dot(hb.astype(w_b.dtype), w_b,
                                   preferred_element_type=jnp.float32)
        hf_new, cf_new = cell(gf, cf)                # two independent chains -> 2x ILP
        hb_new, cb_new = cell(gb, cb)
        yf_ref[s] = hf_new.astype(yf_ref.dtype)
        yb_ref[tb] = hb_new.astype(yb_ref.dtype)
        return hf_new, cf_new, hb_new, cb_new

    carry0 = (h_scr[0], c_scr[0], h_scr[1], c_scr[1])
    # Short fixed trip-count -> unroll so the scheduler can overlap one chain's MXU dot
    # with the other chain's EUP/VPU tail.
    hf, cf, hb, cb = lax.fori_loop(0, t_chunk, step, carry0, unroll=True)
    h_scr[0] = hf
    c_scr[0] = cf
    h_scr[1] = hb
    c_scr[1] = cb


# ---------------------------------------------------------------------------
# One bidirectional layer = projection pallas_call + recurrent pallas_call.
# ---------------------------------------------------------------------------
def _bilstm_layer(x_streams, w_comb, b_comb, whh, hid, t_chunk):
    """x_streams: tuple of (T, B, F) fp32 -> (y_fwd, y_bwd) each (T, B, H) fp32."""
    n_streams = len(x_streams)
    seq_len, batch, feat = x_streams[0].shape
    nc = seq_len // t_chunk

    # 1) Hoisted input projection: one grid-tiled MXU matmul covering both directions.
    proj_kernel = _gate_proj_kernel_1 if n_streams == 1 else _gate_proj_kernel_2
    x_specs = [pl.BlockSpec((t_chunk, batch, feat), lambda i: (i, 0, 0))
               for _ in range(n_streams)]
    gx_f, gx_b = pl.pallas_call(
        proj_kernel,
        out_shape=(jax.ShapeDtypeStruct((seq_len, batch, 4 * hid), jnp.float32),
                   jax.ShapeDtypeStruct((seq_len, batch, 4 * hid), jnp.float32)),
        grid=(nc,),
        in_specs=x_specs + [
            pl.BlockSpec((n_streams, feat, 8 * hid), lambda i: (0, 0, 0)),
            pl.BlockSpec((1, 8 * hid), lambda i: (0, 0)),
        ],
        out_specs=(pl.BlockSpec((t_chunk, batch, 4 * hid), lambda i: (i, 0, 0)),
                   pl.BlockSpec((t_chunk, batch, 4 * hid), lambda i: (i, 0, 0))),
        compiler_params=pltpu.CompilerParams(
            dimension_semantics=("parallel",),
            vmem_limit_bytes=_VMEM_LIMIT_BYTES),
    )(*x_streams, w_comb, b_comb)

    # 2) Recurrence. Sequential chunk axis; h/c carried in VMEM scratch across chunks.
    #    The backward direction's chunks are visited in reverse purely via index_maps.
    y_f, y_b = pl.pallas_call(
        _lstm_rec_kernel,
        out_shape=(jax.ShapeDtypeStruct((seq_len, batch, hid), jnp.float32),
                   jax.ShapeDtypeStruct((seq_len, batch, hid), jnp.float32)),
        grid=(nc,),
        in_specs=[
            pl.BlockSpec((t_chunk, batch, 4 * hid), lambda c: (c, 0, 0)),
            pl.BlockSpec((t_chunk, batch, 4 * hid), lambda c: (nc - 1 - c, 0, 0)),
            pl.BlockSpec((2, hid, 4 * hid), lambda c: (0, 0, 0)),
        ],
        out_specs=(
            pl.BlockSpec((t_chunk, batch, hid), lambda c: (c, 0, 0)),
            pl.BlockSpec((t_chunk, batch, hid), lambda c: (nc - 1 - c, 0, 0)),
        ),
        scratch_shapes=[
            pltpu.VMEM((2, batch, hid), jnp.float32),   # h carry (fwd, bwd)
            pltpu.VMEM((2, batch, hid), jnp.float32),   # c carry (fwd, bwd)
        ],
        compiler_params=pltpu.CompilerParams(
            dimension_semantics=("arbitrary",),
            vmem_limit_bytes=_VMEM_LIMIT_BYTES),
    )(gx_f, gx_b, whh)
    return y_f, y_b


def _prep_layer_weights(layer, hidden_dim, n_streams):
    """PyTorch-layout LSTM weights -> kernel layout (transposed, direction-combined, bf16)."""
    hid = hidden_dim
    wih_f_t = layer["w_ih_f"].T          # (Din, 4H)
    wih_b_t = layer["w_ih_b"].T
    if n_streams == 1:
        w_comb = jnp.concatenate([wih_f_t, wih_b_t], axis=1)[None]        # (1, Din, 8H)
    else:
        # Layer > 0 consumes the previous layer's [fwd | bwd] streams; split the rows so
        # each direction stream gets its own (H, 8H) slab -> the concat never materializes.
        w_comb = jnp.stack([
            jnp.concatenate([wih_f_t[:hid], wih_b_t[:hid]], axis=1),
            jnp.concatenate([wih_f_t[hid:], wih_b_t[hid:]], axis=1),
        ])                                                                 # (2, H, 8H)
    b_comb = jnp.concatenate([layer["b_f"], layer["b_b"]]).reshape(1, 8 * hid)
    whh = jnp.stack([layer["w_hh_f"].T, layer["w_hh_b"].T])                # (2, H, 4H)
    return w_comb.astype(_MXU_DTYPE), b_comb.astype(jnp.float32), whh.astype(_MXU_DTYPE)


# ---------------------------------------------------------------------------
# Full forward pass (BiLSTMS.forward, eval semantics)
# ---------------------------------------------------------------------------
def bilstms_forward(text, params):
    """text: (T, B) int32 -> logits (B, output_dim)."""
    hid = params["lstm"][0]["w_hh_f"].shape[1]
    seq_len = text.shape[0]
    t_chunk = _pick_time_chunk(seq_len)

    # Embedding lookup: data-dependent gather, left to XLA (not a Pallas hot path).
    x = params["embedding"][text]            # (T, B, E) fp32
    # self.dropout(embedding): identity at inference.
    streams = (x,)                           # single input stream for layer 0

    y_f = y_b = None
    for li, layer in enumerate(params["lstm"]):
        w_comb, b_comb, whh = _prep_layer_weights(
            layer, hid, n_streams=1 if li == 0 else 2)
        y_f, y_b = _bilstm_layer(streams, w_comb, b_comb, whh, hid, t_chunk)
        streams = (y_f, y_b)                 # next layer reads both direction streams
        # inter-layer LSTM dropout: identity at inference.

    # hidden_state[-2] = last-layer forward final h (time T-1);
    # hidden_state[-1] = last-layer backward final h (time 0).
    h_cat = jnp.concatenate([y_f[seq_len - 1], y_b[0]], axis=-1)   # (B, 2H)
    # self.dropout(h_cat): identity at inference.
    # Final Linear left to XLA: a (B,2H)x(2H,2) matmul is far below pallas_call overhead
    # and its 2-lane output would force a masked store; fc_w is stored pre-transposed.
    return h_cat @ params["fc_w_t"] + params["fc_b"]


# ---------------------------------------------------------------------------
# Pure-JAX reference (same bf16-operand / fp32-accumulate discipline) for self-check.
# ---------------------------------------------------------------------------
def _bilstm_reference(text, params):
    hid = params["lstm"][0]["w_hh_f"].shape[1]

    def bf16(a):
        return a.astype(_MXU_DTYPE).astype(jnp.float32)

    def run_dir(x_seq, w_ih, w_hh, b, reverse):
        w_ih_t = bf16(w_ih.T)      # (Din, 4H)
        w_hh_t = bf16(w_hh.T)      # (H, 4H)

        def step(carry, x_t):
            h, c = carry
            gates = bf16(x_t) @ w_ih_t + bf16(h) @ w_hh_t + b
            i = jax.nn.sigmoid(gates[:, 0 * hid:1 * hid])
            f = jax.nn.sigmoid(gates[:, 1 * hid:2 * hid])
            g = jnp.tanh(gates[:, 2 * hid:3 * hid])
            o = jax.nn.sigmoid(gates[:, 3 * hid:4 * hid])
            c = f * c + i * g
            h = o * jnp.tanh(c)
            return (h, c), h

        batch = x_seq.shape[1]
        carry0 = (jnp.zeros((batch, hid), jnp.float32),
                  jnp.zeros((batch, hid), jnp.float32))
        xs = x_seq[::-1] if reverse else x_seq
        _, ys = lax.scan(step, carry0, xs)
        return ys[::-1] if reverse else ys

    x = params["embedding"][text]
    y_f = y_b = None
    for layer in params["lstm"]:
        y_f = run_dir(x, layer["w_ih_f"], layer["w_hh_f"], layer["b_f"], False)
        y_b = run_dir(x, layer["w_ih_b"], layer["w_hh_b"], layer["b_b"], True)
        x = jnp.concatenate([y_f, y_b], axis=-1)
    seq_len = text.shape[0]
    h_cat = jnp.concatenate([y_f[seq_len - 1], y_b[0]], axis=-1)
    return h_cat @ params["fc_w_t"] + params["fc_b"]


# ---------------------------------------------------------------------------
# Deterministic parameter construction (shapes from the module __init__).
# ---------------------------------------------------------------------------
def make_params(key, vocab_size, embedding_dim, hidden_dim, output_dim,
                padding_idx, num_layers):
    keys = jax.random.split(key, 3 + num_layers)
    emb = 0.1 * jax.random.normal(keys[0], (vocab_size, embedding_dim), jnp.float32)
    emb = emb.at[padding_idx].set(0.0)       # padding_idx row is zero

    k = 1.0 / jnp.sqrt(hidden_dim)
    lstm_layers = []
    for l in range(num_layers):
        d_in = embedding_dim if l == 0 else 2 * hidden_dim
        lk = jax.random.split(keys[3 + l], 8)
        u = lambda kk, shape: jax.random.uniform(kk, shape, jnp.float32, -k, k)
        lstm_layers.append({
            "w_ih_f": u(lk[0], (4 * hidden_dim, d_in)),
            "w_hh_f": u(lk[1], (4 * hidden_dim, hidden_dim)),
            # PyTorch has separate b_ih and b_hh; they are always summed -> fold them.
            "b_f": u(lk[2], (4 * hidden_dim,)) + u(lk[3], (4 * hidden_dim,)),
            "w_ih_b": u(lk[4], (4 * hidden_dim, d_in)),
            "w_hh_b": u(lk[5], (4 * hidden_dim, hidden_dim)),
            "b_b": u(lk[6], (4 * hidden_dim,)) + u(lk[7], (4 * hidden_dim,)),
        })

    kf = 1.0 / jnp.sqrt(2 * hidden_dim)
    fc_w = jax.random.uniform(keys[1], (output_dim, 2 * hidden_dim), jnp.float32, -kf, kf)
    fc_b = jax.random.uniform(keys[2], (output_dim,), jnp.float32, -kf, kf)

    return {"embedding": emb, "lstm": lstm_layers,
            "fc_w_t": fc_w.T, "fc_b": fc_b}   # fc weight stored pre-transposed


if __name__ == "__main__":
    # Small, module-consistent shapes (B a full fp32 sublane tile, 4H = 128 lanes).
    vocab_size = 50
    embedding_dim = 32
    hidden_dim = 32
    output_dim = 2
    padding_idx = 0
    num_layers = 2
    seq_len = 16
    batch = 8

    key = jax.random.PRNGKey(0)
    k_text, k_params = jax.random.split(key)

    text = jax.random.randint(k_text, (seq_len, batch), 0, vocab_size, dtype=jnp.int32)
    params = make_params(k_params, vocab_size, embedding_dim, hidden_dim,
                         output_dim, padding_idx, num_layers)

    out = jax.jit(bilstms_forward)(text, params)
    out = jax.block_until_ready(out)
    assert out.shape == (batch, output_dim)

    ref = jax.block_until_ready(jax.jit(_bilstm_reference)(text, params))
    max_diff = jnp.max(jnp.abs(out - ref))
    assert jnp.allclose(out, ref, atol=5e-3, rtol=5e-3), f"max abs diff {max_diff}"

    print("KERNEL_OK")
</pallas_src>

<mosaic_0001>
module attributes {stable_mosaic.version = 11 : i64} {
  func.func @_gate_proj_kernel_1(%arg0: i32, %arg1: memref<8x8x32xf32, #tpu.memory_space<vmem>>, %arg2: memref<1x32x256xbf16, #tpu.memory_space<vmem>>, %arg3: memref<1x256xf32, #tpu.memory_space<vmem>>, %arg4: memref<8x8x128xf32, #tpu.memory_space<vmem>>, %arg5: memref<8x8x128xf32, #tpu.memory_space<vmem>>) attributes {dimension_semantics = [#tpu.dimension_semantics<parallel>], iteration_bounds = array<i64: 2>, scalar_prefetch = 0 : i64, scratch_operands = 0 : i64, tpu.core_type = #tpu.core_type<tc>, window_params = [{transform_indices = @transform_0, window_bounds = array<i64: 8, 8, 32>}, {pipeline_mode = #tpu.pipeline_mode<synchronous>, transform_indices = @transform_1, window_bounds = array<i64: 1, 32, 256>}, {pipeline_mode = #tpu.pipeline_mode<synchronous>, transform_indices = @transform_2, window_bounds = array<i64: 1, 256>}, {transform_indices = @transform_3, window_bounds = array<i64: 8, 8, 128>}, {transform_indices = @transform_4, window_bounds = array<i64: 8, 8, 128>}]} {
    %c0 = arith.constant 0 : index
    %c0_0 = arith.constant 0 : index
    %c0_1 = arith.constant 0 : index
    %0 = vector.load %arg1[%c0, %c0_0, %c0_1] : memref<8x8x32xf32, #tpu.memory_space<vmem>>, vector<8x8x32xf32>
    %1 = vector.shape_cast %0 : vector<8x8x32xf32> to vector<64x32xf32>
    %2 = arith.truncf %1 : vector<64x32xf32> to vector<64x32xbf16>
    %c0_2 = arith.constant 0 : index
    %c0_3 = arith.constant 0 : index
    %c0_4 = arith.constant 0 : index
    %3 = vector.load %arg2[%c0_2, %c0_3, %c0_4] : memref<1x32x256xbf16, #tpu.memory_space<vmem>>, vector<1x32x256xbf16>
    %4 = vector.shape_cast %3 : vector<1x32x256xbf16> to vector<32x256xbf16>
    %cst = arith.constant dense<0.000000e+00> : vector<64x256xf32>
    %5 = tpu.matmul %2, %4, %cst {dimension_numbers = #tpu.dot_dimension_numbers<[1], [0], [0], [1], [0, 0, 1, 1], [], []>} : vector<64x32xbf16>, vector<32x256xbf16>, vector<64x256xf32> -> vector<64x256xf32>
    %c0_5 = arith.constant 0 : index
    %c0_6 = arith.constant 0 : index
    %6 = vector.load %arg3[%c0_5, %c0_6] : memref<1x256xf32, #tpu.memory_space<vmem>>, vector<1x256xf32>
    %7 = vector.broadcast %6 : vector<1x256xf32> to vector<64x256xf32>
    %8 = arith.addf %5, %7 : vector<64x256xf32>
    %9 = vector.extract_strided_slice %8 {offsets = [0, 0], sizes = [64, 128], strides = [1, 1]} : vector<64x256xf32> to vector<64x128xf32>
    %10 = vector.shape_cast %9 : vector<64x128xf32> to vector<8x8x128xf32>
    %c0_7 = arith.constant 0 : index
    %c0_8 = arith.constant 0 : index
    %c0_9 = arith.constant 0 : index
    %11 = vector.load %arg4[%c0_7, %c0_8, %c0_9] : memref<8x8x128xf32, #tpu.memory_space<vmem>>, vector<8x8x128xf32>
    tpu.vector_store %arg4[%c0_7, %c0_8, %c0_9], %10 {strides = array<i32>} : memref<8x8x128xf32, #tpu.memory_space<vmem>>, vector<8x8x128xf32>,
    %12 = vector.extract_strided_slice %8 {offsets = [0, 128], sizes = [64, 128], strides = [1, 1]} : vector<64x256xf32> to vector<64x128xf32>
    %13 = vector.shape_cast %12 : vector<64x128xf32> to vector<8x8x128xf32>
    %c0_10 = arith.constant 0 : index
    %c0_11 = arith.constant 0 : index
    %c0_12 = arith.constant 0 : index
    %14 = vector.load %arg5[%c0_10, %c0_11, %c0_12] : memref<8x8x128xf32, #tpu.memory_space<vmem>>, vector<8x8x128xf32>
    tpu.vector_store %arg5[%c0_10, %c0_11, %c0_12], %13 {strides = array<i32>} : memref<8x8x128xf32, #tpu.memory_space<vmem>>, vector<8x8x128xf32>,
    return
  }
  func.func @transform_0(%arg0: i32) -> (i32, i32, i32) {
    %c0_i32 = arith.constant 0 : i32
    %c0_i32_0 = arith.constant 0 : i32
    %c0_i32_1 = arith.constant 0 : i32
    return %arg0, %c0_i32, %c0_i32_0 : i32, i32, i32
  }
  func.func @transform_1(%arg0: i32) -> (i32, i32, i32) {
    %c0_i32 = arith.constant 0 : i32
    %c0_i32_0 = arith.constant 0 : i32
    %c0_i32_1 = arith.constant 0 : i32
    %c0_i32_2 = arith.constant 0 : i32
    return %c0_i32, %c0_i32_0, %c0_i32_1 : i32, i32, i32
  }
  func.func @transform_2(%arg0: i32) -> (i32, i32) {
    %c0_i32 = arith.constant 0 : i32
    %c0_i32_0 = arith.constant 0 : i32
    %c0_i32_1 = arith.constant 0 : i32
    return %c0_i32, %c0_i32_0 : i32, i32
  }
  func.func @transform_3(%arg0: i32) -> (i32, i32, i32) {
    %c0_i32 = arith.constant 0 : i32
    %c0_i32_0 = arith.constant 0 : i32
    %c0_i32_1 = arith.constant 0 : i32
    return %arg0, %c0_i32, %c0_i32_0 : i32, i32, i32
  }
  func.func @transform_4(%arg0: i32) -> (i32, i32, i32) {
    %c0_i32 = arith.constant 0 : i32
    %c0_i32_0 = arith.constant 0 : i32
    %c0_i32_1 = arith.constant 0 : i32
    return %arg0, %c0_i32, %c0_i32_0 : i32, i32, i32
  }
}

module attributes {stable_mosaic.version = 11 : i64} {
  func.func @_lstm_rec_kernel(%arg0: i32, %arg1: memref<8x8x128xf32, #tpu.memory_space<vmem>>, %arg2: memref<8x8x128xf32, #tpu.memory_space<vmem>>, %arg3: memref<2x32x128xbf16, #tpu.memory_space<vmem>>, %arg4: memref<8x8x32xf32, #tpu.memory_space<vmem>>, %arg5: memref<8x8x32xf32, #tpu.memory_space<vmem>>, %arg6: memref<2x8x32xf32, #tpu.memory_space<vmem>>, %arg7: memref<2x8x32xf32, #tpu.memory_space<vmem>>) attributes {dimension_semantics = [#tpu.dimension_semantics<arbitrary>], iteration_bounds = array<i64: 2>, scalar_prefetch = 0 : i64, scratch_operands = 2 : i64, tpu.core_type = #tpu.core_type<tc>, window_params = [{transform_indices = @transform_0, window_bounds = array<i64: 8, 8, 128>}, {transform_indices = @transform_1, window_bounds = array<i64: 8, 8, 128>}, {pipeline_mode = #tpu.pipeline_mode<synchronous>, transform_indices = @transform_2, window_bounds = array<i64: 2, 32, 128>}, {transform_indices = @transform_3, window_bounds = array<i64: 8, 8, 32>}, {transform_indices = @transform_4, window_bounds = array<i64: 8, 8, 32>}]} {
    %c0_i32 = arith.constant 0 : i32
    %0 = arith.cmpi eq, %arg0, %c0_i32 : i32
    %1 = arith.extui %0 : i1 to i32
    %c0_i32_0 = arith.constant 0 : i32
    %2 = arith.cmpi ne, %1, %c0_i32_0 : i32
    scf.if %2 {
      %cst_165 = arith.constant 0.000000e+00 : f32
      %595 = vector.broadcast %cst_165 : f32 to vector<2x8x32xf32>
      %c0_166 = arith.constant 0 : index
      %c0_167 = arith.constant 0 : index
      %c0_168 = arith.constant 0 : index
      %596 = vector.load %arg6[%c0_166, %c0_167, %c0_168] : memref<2x8x32xf32, #tpu.memory_space<vmem>>, vector<2x8x32xf32>
      tpu.vector_store %arg6[%c0_166, %c0_167, %c0_168], %595 {strides = array<i32>} : memref<2x8x32xf32, #tpu.memory_space<vmem>>, vector<2x8x32xf32>,
      %cst_169 = arith.constant 0.000000e+00 : f32
      %597 = vector.broadcast %cst_169 : f32 to vector<2x8x32xf32>
      %c0_170 = arith.constant 0 : index
      %c0_171 = arith.constant 0 : index
      %c0_172 = arith.constant 0 : index
      %598 = vector.load %arg7[%c0_170, %c0_171, %c0_172] : memref<2x8x32xf32, #tpu.memory_space<vmem>>, vector<2x8x32xf32>
      tpu.vector_store %arg7[%c0_170, %c0_171, %c0_172], %597 {strides = array<i32>} : memref<2x8x32xf32, #tpu.memory_space<vmem>>, vector<2x8x32xf32>,
    } else {
    }
    %c0 = arith.constant 0 : index
    %c0_1 = arith.constant 0 : index
    %c0_2 = arith.constant 0 : index
    %3 = vector.load %arg3[%c0, %c0_1, %c0_2] : memref<2x32x128xbf16, #tpu.memory_space<vmem>>, vector<1x32x128xbf16>
    %4 = vector.shape_cast %3 : vector<1x32x128xbf16> to vector<32x128xbf16>
    %c1 = arith.constant 1 : index
    %c0_3 = arith.constant 0 : index
    %c0_4 = arith.constant 0 : index
    %5 = vector.load %arg3[%c1, %c0_3, %c0_4] : memref<2x32x128xbf16, #tpu.memory_space<vmem>>, vector<1x32x128xbf16>
    %6 = vector.shape_cast %5 : vector<1x32x128xbf16> to vector<32x128xbf16>
    %c0_5 = arith.constant 0 : index
    %c0_6 = arith.constant 0 : index
    %c0_7 = arith.constant 0 : index
    %7 = vector.load %arg6[%c0_5, %c0_6, %c0_7] : memref<2x8x32xf32, #tpu.memory_space<vmem>>, vector<1x8x32xf32>
    %8 = vector.shape_cast %7 : vector<1x8x32xf32> to vector<8x32xf32>
    %c0_8 = arith.constant 0 : index
    %c0_9 = arith.constant 0 : index
    %c0_10 = arith.constant 0 : index
    %9 = vector.load %arg7[%c0_8, %c0_9, %c0_10] : memref<2x8x32xf32, #tpu.memory_space<vmem>>, vector<1x8x32xf32>
    %10 = vector.shape_cast %9 : vector<1x8x32xf32> to vector<8x32xf32>
    %c1_11 = arith.constant 1 : index
    %c0_12 = arith.constant 0 : index
    %c0_13 = arith.constant 0 : index
    %11 = vector.load %arg6[%c1_11, %c0_12, %c0_13] : memref<2x8x32xf32, #tpu.memory_space<vmem>>, vector<1x8x32xf32>
    %12 = vector.shape_cast %11 : vector<1x8x32xf32> to vector<8x32xf32>
    %c1_14 = arith.constant 1 : index
    %c0_15 = arith.constant 0 : index
    %c0_16 = arith.constant 0 : index
    %13 = vector.load %arg7[%c1_14, %c0_15, %c0_16] : memref<2x8x32xf32, #tpu.memory_space<vmem>>, vector<1x8x32xf32>
    %14 = vector.shape_cast %13 : vector<1x8x32xf32> to vector<8x32xf32>
    %c0_i32_17 = arith.constant 0 : i32
    %c7_i32 = arith.constant 7 : i32
    %15 = arith.subi %c7_i32, %c0_i32_17 : i32
    %16 = arith.index_cast %c0_i32_17 : i32 to index
    %c0_18 = arith.constant 0 : index
    %c0_19 = arith.constant 0 : index
    %17 = vector.load %arg1[%16, %c0_18, %c0_19] : memref<8x8x128xf32, #tpu.memory_space<vmem>>, vector<1x8x128xf32>
    %18 = vector.shape_cast %17 : vector<1x8x128xf32> to vector<8x128xf32>
    %19 = arith.truncf %8 : vector<8x32xf32> to vector<8x32xbf16>
    %cst = arith.constant dense<0.000000e+00> : vector<8x128xf32>
    %20 = tpu.matmul %19, %4, %cst {dimension_numbers = #tpu.dot_dimension_numbers<[1], [0], [0], [1], [0, 0, 1, 1], [], []>} : vector<8x32xbf16>, vector<32x128xbf16>, vector<8x128xf32> -> vector<8x128xf32>
    %21 = arith.addf %18, %20 : vector<8x128xf32>
    %22 = arith.index_cast %15 : i32 to index
    %c0_20 = arith.constant 0 : index
    %c0_21 = arith.constant 0 : index
    %23 = vector.load %arg2[%22, %c0_20, %c0_21] : memref<8x8x128xf32, #tpu.memory_space<vmem>>, vector<1x8x128xf32>
    %24 = vector.shape_cast %23 : vector<1x8x128xf32> to vector<8x128xf32>
    %25 = arith.truncf %12 : vector<8x32xf32> to vector<8x32xbf16>
    %cst_22 = arith.constant dense<0.000000e+00> : vector<8x128xf32>
    %26 = tpu.matmul %25, %6, %cst_22 {dimension_numbers = #tpu.dot_dimension_numbers<[1], [0], [0], [1], [0, 0, 1, 1], [], []>} : vector<8x32xbf16>, vector<32x128xbf16>, vector<8x128xf32> -> vector<8x128xf32>
    %27 = arith.addf %24, %26 : vector<8x128xf32>
    %28 = vector.extract_strided_slice %21 {offsets = [0, 0], sizes = [8, 32], strides = [1, 1]} : vector<8x128xf32> to vector<8x32xf32>
    %29 = arith.negf %28 : vector<8x32xf32>
    %30 = math.exp %29 : vector<8x32xf32>
    %cst_23 = arith.constant 1.000000e+00 : f32
    %31 = vector.broadcast %cst_23 : f32 to vector<8x32xf32>
    %32 = arith.addf %31, %30 : vector<8x32xf32>
    %33 = arith.divf %31, %32 : vector<8x32xf32>
    %34 = vector.extract_strided_slice %21 {offsets = [0, 32], sizes = [8, 32], strides = [1, 1]} : vector<8x128xf32> to vector<8x32xf32>
    %35 = arith.negf %34 : vector<8x32xf32>
    %36 = math.exp %35 : vector<8x32xf32>
    %cst_24 = arith.constant 1.000000e+00 : f32
    %37 = vector.broadcast %cst_24 : f32 to vector<8x32xf32>
    %38 = arith.addf %37, %36 : vector<8x32xf32>
    %39 = arith.divf %37, %38 : vector<8x32xf32>
    %40 = vector.extract_strided_slice %21 {offsets = [0, 64], sizes = [8, 32], strides = [1, 1]} : vector<8x128xf32> to vector<8x32xf32>
    %41 = math.tanh %40 : vector<8x32xf32>
    %42 = vector.extract_strided_slice %21 {offsets = [0, 96], sizes = [8, 32], strides = [1, 1]} : vector<8x128xf32> to vector<8x32xf32>
    %43 = arith.negf %42 : vector<8x32xf32>
    %44 = math.exp %43 : vector<8x32xf32>
    %cst_25 = arith.constant 1.000000e+00 : f32
    %45 = vector.broadcast %cst_25 : f32 to vector<8x32xf32>
    %46 = arith.addf %45, %44 : vector<8x32xf32>
    %47 = arith.divf %45, %46 : vector<8x32xf32>
    %48 = arith.mulf %39, %10 : vector<8x32xf32>
    %49 = arith.mulf %33, %41 : vector<8x32xf32>
    %50 = arith.addf %48, %49 : vector<8x32xf32>
    %51 = math.tanh %50 : vector<8x32xf32>
    %52 = arith.mulf %47, %51 : vector<8x32xf32>
    %53 = vector.extract_strided_slice %27 {offsets = [0, 0], sizes = [8, 32], strides = [1, 1]} : vector<8x128xf32> to vector<8x32xf32>
    %54 = arith.negf %53 : vector<8x32xf32>
    %55 = math.exp %54 : vector<8x32xf32>
    %cst_26 = arith.constant 1.000000e+00 : f32
    %56 = vector.broadcast %cst_26 : f32 to vector<8x32xf32>
    %57 = arith.addf %56, %55 : vector<8x32xf32>
    %58 = arith.divf %56, %57 : vector<8x32xf32>
    %59 = vector.extract_strided_slice %27 {offsets = [0, 32], sizes = [8, 32], strides = [1, 1]} : vector<8x128xf32> to vector<8x32xf32>
    %60 = arith.negf %59 : vector<8x32xf32>
    %61 = math.exp %60 : vector<8x32xf32>
    %cst_27 = arith.constant 1.000000e+00 : f32
    %62 = vector.broadcast %cst_27 : f32 to vector<8x32xf32>
    %63 = arith.addf %62, %61 : vector<8x32xf32>
    %64 = arith.divf %62, %63 : vector<8x32xf32>
    %65 = vector.extract_strided_slice %27 {offsets = [0, 64], sizes = [8, 32], strides = [1, 1]} : vector<8x128xf32> to vector<8x32xf32>
    %66 = math.tanh %65 : vector<8x32xf32>
    %67 = vector.extract_strided_slice %27 {offsets = [0, 96], sizes = [8, 32], strides = [1, 1]} : vector<8x128xf32> to vector<8x32xf32>
    %68 = arith.negf %67 : vector<8x32xf32>
    %69 = math.exp %68 : vector<8x32xf32>
    %cst_28 = arith.constant 1.000000e+00 : f32
    %70 = vector.broadcast %cst_28 : f32 to vector<8x32xf32>
    %71 = arith.addf %70, %69 : vector<8x32xf32>
    %72 = arith.divf %70, %71 : vector<8x32xf32>
    %73 = arith.mulf %64, %14 : vector<8x32xf32>
    %74 = arith.mulf %58, %66 : vector<8x32xf32>
    %75 = arith.addf %73, %74 : vector<8x32xf32>
    %76 = math.tanh %75 : vector<8x32xf32>
    %77 = arith.mulf %72, %76 : vector<8x32xf32>
    %78 = arith.index_cast %c0_i32_17 : i32 to index
    %c0_29 = arith.constant 0 : index
    %c0_30 = arith.constant 0 : index
    %79 = vector.load %arg4[%78, %c0_29, %c0_30] : memref<8x8x32xf32, #tpu.memory_space<vmem>>, vector<1x8x32xf32>
    %80 = vector.shape_cast %79 : vector<1x8x32xf32> to vector<8x32xf32>
    %81 = vector.shape_cast %52 : vector<8x32xf32> to vector<1x8x32xf32>
    tpu.vector_store %arg4[%78, %c0_29, %c0_30], %81 {strides = array<i32>} : memref<8x8x32xf32, #tpu.memory_space<vmem>>, vector<1x8x32xf32>,
    %82 = arith.index_cast %15 : i32 to index
    %c0_31 = arith.constant 0 : index
    %c0_32 = arith.constant 0 : index
    %83 = vector.load %arg5[%82, %c0_31, %c0_32] : memref<8x8x32xf32, #tpu.memory_space<vmem>>, vector<1x8x32xf32>
    %84 = vector.shape_cast %83 : vector<1x8x32xf32> to vector<8x32xf32>
    %85 = vector.shape_cast %77 : vector<8x32xf32> to vector<1x8x32xf32>
    tpu.vector_store %arg5[%82, %c0_31, %c0_32], %85 {strides = array<i32>} : memref<8x8x32xf32, #tpu.memory_space<vmem>>, vector<1x8x32xf32>,
    %c1_i32 = arith.constant 1 : i32
    %c7_i32_33 = arith.constant 7 : i32
    %86 = arith.subi %c7_i32_33, %c1_i32 : i32
    %87 = arith.index_cast %c1_i32 : i32 to index
    %c0_34 = arith.constant 0 : index
    %c0_35 = arith.constant 0 : index
    %88 = vector.load %arg1[%87, %c0_34, %c0_35] : memref<8x8x128xf32, #tpu.memory_space<vmem>>, vector<1x8x128xf32>
    %89 = vector.shape_cast %88 : vector<1x8x128xf32> to vector<8x128xf32>
    %90 = arith.truncf %52 : vector<8x32xf32> to vector<8x32xbf16>
    %cst_36 = arith.constant dense<0.000000e+00> : vector<8x128xf32>
    %91 = tpu.matmul %90, %4, %cst_36 {dimension_numbers = #tpu.dot_dimension_numbers<[1], [0], [0], [1], [0, 0, 1, 1], [], []>} : vector<8x32xbf16>, vector<32x128xbf16>, vector<8x128xf32> -> vector<8x128xf32>
    %92 = arith.addf %89, %91 : vector<8x128xf32>
    %93 = arith.index_cast %86 : i32 to index
    %c0_37 = arith.constant 0 : index
    %c0_38 = arith.constant 0 : index
    %94 = vector.load %arg2[%93, %c0_37, %c0_38] : memref<8x8x128xf32, #tpu.memory_space<vmem>>, vector<1x8x128xf32>
    %95 = vector.shape_cast %94 : vector<1x8x128xf32> to vector<8x128xf32>
    %96 = arith.truncf %77 : vector<8x32xf32> to vector<8x32xbf16>
    %cst_39 = arith.constant dense<0.000000e+00> : vector<8x128xf32>
    %97 = tpu.matmul %96, %6, %cst_39 {dimension_numbers = #tpu.dot_dimension_numbers<[1], [0], [0], [1], [0, 0, 1, 1], [], []>} : vector<8x32xbf16>, vector<32x128xbf16>, vector<8x128xf32> -> vector<8x128xf32>
    %98 = arith.addf %95, %97 : vector<8x128xf32>
    %99 = vector.extract_strided_slice %92 {offsets = [0, 0], sizes = [8, 32], strides = [1, 1]} : vector<8x128xf32> to vector<8x32xf32>
    %100 = arith.negf %99 : vector<8x32xf32>
    %101 = math.exp %100 : vector<8x32xf32>
    %cst_40 = arith.constant 1.000000e+00 : f32
    %102 = vector.broadcast %cst_40 : f32 to vector<8x32xf32>
    %103 = arith.addf %102, %101 : vector<8x32xf32>
    %104 = arith.divf %102, %103 : vector<8x32xf32>
    %105 = vector.extract_strided_slice %92 {offsets = [0, 32], sizes = [8, 32], strides = [1, 1]} : vector<8x128xf32> to vector<8x32xf32>
    %106 = arith.negf %105 : vector<8x32xf32>
    %107 = math.exp %106 : vector<8x32xf32>
    %cst_41 = arith.constant 1.000000e+00 : f32
    %108 = vector.broadcast %cst_41 : f32 to vector<8x32xf32>
    %109 = arith.addf %108, %107 : vector<8x32xf32>
    %110 = arith.divf %108, %109 : vector<8x32xf32>
    %111 = vector.extract_strided_slice %92 {offsets = [0, 64], sizes = [8, 32], strides = [1, 1]} : vector<8x128xf32> to vector<8x32xf32>
    %112 = math.tanh %111 : vector<8x32xf32>
    %113 = vector.extract_strided_slice %92 {offsets = [0, 96], sizes = [8, 32], strides = [1, 1]} : vector<8x128xf32> to vector<8x32xf32>
    %114 = arith.negf %113 : vector<8x32xf32>
    %115 = math.exp %114 : vector<8x32xf32>
    %cst_42 = arith.constant 1.000000e+00 : f32
    %116 = vector.broadcast %cst_42 : f32 to vector<8x32xf32>
    %117 = arith.addf %116, %115 : vector<8x32xf32>
    %118 = arith.divf %116, %117 : vector<8x32xf32>
    %119 = arith.mulf %110, %50 : vector<8x32xf32>
    %120 = arith.mulf %104, %112 : vector<8x32xf32>
    %121 = arith.addf %119, %120 : vector<8x32xf32>
    %122 = math.tanh %121 : vector<8x32xf32>
    %123 = arith.mulf %118, %122 : vector<8x32xf32>
    %124 = vector.extract_strided_slice %98 {offsets = [0, 0], sizes = [8, 32], strides = [1, 1]} : vector<8x128xf32> to vector<8x32xf32>
    %125 = arith.negf %124 : vector<8x32xf32>
    %126 = math.exp %125 : vector<8x32xf32>
    %cst_43 = arith.constant 1.000000e+00 : f32
    %127 = vector.broadcast %cst_43 : f32 to vector<8x32xf32>
    %128 = arith.addf %127, %126 : vector<8x32xf32>
    %129 = arith.divf %127, %128 : vector<8x32xf32>
    %130 = vector.extract_strided_slice %98 {offsets = [0, 32], sizes = [8, 32], strides = [1, 1]} : vector<8x128xf32> to vector<8x32xf32>
    %131 = arith.negf %130 : vector<8x32xf32>
    %132 = math.exp %131 : vector<8x32xf32>
    %cst_44 = arith.constant 1.000000e+00 : f32
    %133 = vector.broadcast %cst_44 : f32 to vector<8x32xf32>
    %134 = arith.addf %133, %132 : vector<8x32xf32>
    %135 = arith.divf %133, %134 : vector<8x32xf32>
    %136 = vector.extract_strided_slice %98 {offsets = [0, 64], sizes = [8, 32], strides = [1, 1]} : vector<8x128xf32> to vector<8x32xf32>
    %137 = math.tanh %136 : vector<8x32xf32>
    %138 = vector.extract_strided_slice %98 {offsets = [0, 96], sizes = [8, 32], strides = [1, 1]} : vector<8x128xf32> to vector<8x32xf32>
    %139 = arith.negf %138 : vector<8x32xf32>
    %140 = math.exp %139 : vector<8x32xf32>
    %cst_45 = arith.constant 1.000000e+00 : f32
    %141 = vector.broadcast %cst_45 : f32 to vector<8x32xf32>
    %142 = arith.addf %141, %140 : vector<8x32xf32>
    %143 = arith.divf %141, %142 : vector<8x32xf32>
    %144 = arith.mulf %135, %75 : vector<8x32xf32>
    %145 = arith.mulf %129, %137 : vector<8x32xf32>
    %146 = arith.addf %144, %145 : vector<8x32xf32>
    %147 = math.tanh %146 : vector<8x32xf32>
    %148 = arith.mulf %143, %147 : vector<8x32xf32>
    %149 = arith.index_cast %c1_i32 : i32 to index
    %c0_46 = arith.constant 0 : index
    %c0_47 = arith.constant 0 : index
    %150 = vector.load %arg4[%149, %c0_46, %c0_47] : memref<8x8x32xf32, #tpu.memory_space<vmem>>, vector<1x8x32xf32>
    %151 = vector.shape_cast %150 : vector<1x8x32xf32> to vector<8x32xf32>
    %152 = vector.shape_cast %123 : vector<8x32xf32> to vector<1x8x32xf32>
    tpu.vector_store %arg4[%149, %c0_46, %c0_47], %152 {strides = array<i32>} : memref<8x8x32xf32, #tpu.memory_space<vmem>>, vector<1x8x32xf32>,
    %153 = arith.index_cast %86 : i32 to index
    %c0_48 = arith.constant 0 : index
    %c0_49 = arith.constant 0 : index
    %154 = vector.load %arg5[%153, %c0_48, %c0_49] : memref<8x8x32xf32, #tpu.memory_space<vmem>>, vector<1x8x32xf32>
    %155 = vector.shape_cast %154 : vector<1x8x32xf32> to vector<8x32xf32>
    %156 = vector.shape_cast %148 : vector<8x32xf32> to vector<1x8x32xf32>
    tpu.vector_store %arg5[%153, %c0_48, %c0_49], %156 {strides = array<i32>} : memref<8x8x32xf32, #tpu.memory_space<vmem>>, vector<1x8x32xf32>,
    %c2_i32 = arith.constant 2 : i32
    %c7_i32_50 = arith.constant 7 : i32
    %157 = arith.subi %c7_i32_50, %c2_i32 : i32
    %158 = arith.index_cast %c2_i32 : i32 to index
    %c0_51 = arith.constant 0 : index
    %c0_52 = arith.constant 0 : index
    %159 = vector.load %arg1[%158, %c0_51, %c0_52] : memref<8x8x128xf32, #tpu.memory_space<vmem>>, vector<1x8x128xf32>
    %160 = vector.shape_cast %159 : vector<1x8x128xf32> to vector<8x128xf32>
    %161 = arith.truncf %123 : vector<8x32xf32> to vector<8x32xbf16>
    %cst_53 = arith.constant dense<0.000000e+00> : vector<8x128xf32>
    %162 = tpu.matmul %161, %4, %cst_53 {dimension_numbers = #tpu.dot_dimension_numbers<[1], [0], [0], [1], [0, 0, 1, 1], [], []>} : vector<8x32xbf16>, vector<32x128xbf16>, vector<8x128xf32> -> vector<8x128xf32>
    %163 = arith.addf %160, %162 : vector<8x128xf32>
    %164 = arith.index_cast %157 : i32 to index
    %c0_54 = arith.constant 0 : index
    %c0_55 = arith.constant 0 : index
    %165 = vector.load %arg2[%164, %c0_54, %c0_55] : memref<8x8x128xf32, #tpu.memory_space<vmem>>, vector<1x8x128xf32>
    %166 = vector.shape_cast %165 : vector<1x8x128xf32> to vector<8x128xf32>
    %167 = arith.truncf %148 : vector<8x32xf32> to vector<8x32xbf16>
    %cst_56 = arith.constant dense<0.000000e+00> : vector<8x128xf32>
    %168 = tpu.matmul %167, %6, %cst_56 {dimension_numbers = #tpu.dot_dimension_numbers<[1], [0], [0], [1], [0, 0, 1, 1], [], []>} : vector<8x32xbf16>, vector<32x128xbf16>, vector<8x128xf32> -> vector<8x128xf32>
    %169 = arith.addf %166, %168 : vector<8x128xf32>
    %170 = vector.extract_strided_slice %163 {offsets = [0, 0], sizes = [8, 32], strides = [1, 1]} : vector<8x128xf32> to vector<8x32xf32>
    %171 = arith.negf %170 : vector<8x32xf32>
    %172 = math.exp %171 : vector<8x32xf32>
    %cst_57 = arith.constant 1.000000e+00 : f32
    %173 = vector.broadcast %cst_57 : f32 to vector<8x32xf32>
    %174 = arith.addf %173, %172 : vector<8x32xf32>
    %175 = arith.divf %173, %174 : vector<8x32xf32>
    %176 = vector.extract_strided_slice %163 {offsets = [0, 32], sizes = [8, 32], strides = [1, 1]} : vector<8x128xf32> to vector<8x32xf32>
    %177 = arith.negf %176 : vector<8x32xf32>
    %178 = math.exp %177 : vector<8x32xf32>
    %cst_58 = arith.constant 1.000000e+00 : f32
    %179 = vector.broadcast %cst_58 : f32 to vector<8x32xf32>
    %180 = arith.addf %179, %178 : vector<8x32xf32>
    %181 = arith.divf %179, %180 : vector<8x32xf32>
    %182 = vector.extract_strided_slice %163 {offsets = [0, 64], sizes = [8, 32], strides = [1, 1]} : vector<8x128xf32> to vector<8x32xf32>
    %183 = math.tanh %182 : vector<8x32xf32>
    %184 = vector.extract_strided_slice %163 {offsets = [0, 96], sizes = [8, 32], strides = [1, 1]} : vector<8x128xf32> to vector<8x32xf32>
    %185 = arith.negf %184 : vector<8x32xf32>
    %186 = math.exp %185 : vector<8x32xf32>
    %cst_59 = arith.constant 1.000000e+00 : f32
    %187 = vector.broadcast %cst_59 : f32 to vector<8x32xf32>
    %188 = arith.addf %187, %186 : vector<8x32xf32>
    %189 = arith.divf %187, %188 : vector<8x32xf32>
    %190 = arith.mulf %181, %121 : vector<8x32xf32>
    %191 = arith.mulf %175, %183 : vector<8x32xf32>
    %192 = arith.addf %190, %191 : vector<8x32xf32>
    %193 = math.tanh %192 : vector<8x32xf32>
    %194 = arith.mulf %189, %193 : vector<8x32xf32>
    %195 = vector.extract_strided_slice %169 {offsets = [0, 0], sizes = [8, 32], strides = [1, 1]} : vector<8x128xf32> to vector<8x32xf32>
    %196 = arith.negf %195 : vector<8x32xf32>
    %197 = math.exp %196 : vector<8x32xf32>
    %cst_60 = arith.constant 1.000000e+00 : f32
    %198 = vector.broadcast %cst_60 : f32 to vector<8x32xf32>
    %199 = arith.addf %198, %197 : vector<8x32xf32>
    %200 = arith.divf %198, %199 : vector<8x32xf32>
    %201 = vector.extract_strided_slice %169 {offsets = [0, 32], sizes = [8, 32], strides = [1, 1]} : vector<8x128xf32> to vector<8x32xf32>
    %202 = arith.negf %201 : vector<8x32xf32>
    %203 = math.exp %202 : vector<8x32xf32>
    %cst_61 = arith.constant 1.000000e+00 : f32
    %204 = vector.broadcast %cst_61 : f32 to vector<8x32xf32>
    %205 = arith.addf %204, %203 : vector<8x32xf32>
    %206 = arith.divf %204, %205 : vector<8x32xf32>
    %207 = vector.extract_strided_slice %169 {offsets = [0, 64], sizes = [8, 32], strides = [1, 1]} : vector<8x128xf32> to vector<8x32xf32>
    %208 = math.tanh %207 : vector<8x32xf32>
    %209 = vector.extract_strided_slice %169 {offsets = [0, 96], sizes = [8, 32], strides = [1, 1]} : vector<8x128xf32> to vector<8x32xf32>
    %210 = arith.negf %209 : vector<8x32xf32>
    %211 = math.exp %210 : vector<8x32xf32>
    %cst_62 = arith.constant 1.000000e+00 : f32
    %212 = vector.broadcast %cst_62 : f32 to vector<8x32xf32>
    %213 = arith.addf %212, %211 : vector<8x32xf32>
    %214 = arith.divf %212, %213 : vector<8x32xf32>
    %215 = arith.mulf %206, %146 : vector<8x32xf32>
    %216 = arith.mulf %200, %208 : vector<8x32xf32>
    %217 = arith.addf %215, %216 : vector<8x32xf32>
    %218 = math.tanh %217 : vector<8x32xf32>
    %219 = arith.mulf %214, %218 : vector<8x32xf32>
    %220 = arith.index_cast %c2_i32 : i32 to index
    %c0_63 = arith.constant 0 : index
    %c0_64 = arith.constant 0 : index
    %221 = vector.load %arg4[%220, %c0_63, %c0_64] : memref<8x8x32xf32, #tpu.memory_space<vmem>>, vector<1x8x32xf32>
    %222 = vector.shape_cast %221 : vector<1x8x32xf32> to vector<8x32xf32>
    %223 = vector.shape_cast %194 : vector<8x32xf32> to vector<1x8x32xf32>
    tpu.vector_store %arg4[%220, %c0_63, %c0_64], %223 {strides = array<i32>} : memref<8x8x32xf32, #tpu.memory_space<vmem>>, vector<1x8x32xf32>,
    %224 = arith.index_cast %157 : i32 to index
    %c0_65 = arith.constant 0 : index
    %c0_66 = arith.constant 0 : index
    %225 = vector.load %arg5[%224, %c0_65, %c0_66] : memref<8x8x32xf32, #tpu.memory_space<vmem>>, vector<1x8x32xf32>
    %226 = vector.shape_cast %225 : vector<1x8x32xf32> to vector<8x32xf32>
    %227 = vector.shape_cast %219 : vector<8x32xf32> to vector<1x8x32xf32>
    tpu.vector_store %arg5[%224, %c0_65, %c0_66], %227 {strides = array<i32>} : memref<8x8x32xf32, #tpu.memory_space<vmem>>, vector<1x8x32xf32>,
    %c3_i32 = arith.constant 3 : i32
    %c7_i32_67 = arith.constant 7 : i32
    %228 = arith.subi %c7_i32_67, %c3_i32 : i32
    %229 = arith.index_cast %c3_i32 : i32 to index
    %c0_68 = arith.constant 0 : index
    %c0_69 = arith.constant 0 : index
    %230 = vector.load %arg1[%229, %c0_68, %c0_69] : memref<8x8x128xf32, #tpu.memory_space<vmem>>, vector<1x8x128xf32>
    %231 = vector.shape_cast %230 : vector<1x8x128xf32> to vector<8x128xf32>
    %232 = arith.truncf %194 : vector<8x32xf32> to vector<8x32xbf16>
    %cst_70 = arith.constant dense<0.000000e+00> : vector<8x128xf32>
    %233 = tpu.matmul %232, %4, %cst_70 {dimension_numbers = #tpu.dot_dimension_numbers<[1], [0], [0], [1], [0, 0, 1, 1], [], []>} : vector<8x32xbf16>, vector<32x128xbf16>, vector<8x128xf32> -> vector<8x128xf32>
    %234 = arith.addf %231, %233 : vector<8x128xf32>
    %235 = arith.index_cast %228 : i32 to index
    %c0_71 = arith.constant 0 : index
    %c0_72 = arith.constant 0 : index
    %236 = vector.load %arg2[%235, %c0_71, %c0_72] : memref<8x8x128xf32, #tpu.memory_space<vmem>>, vector<1x8x128xf32>
    %237 = vector.shape_cast %236 : vector<1x8x128xf32> to vector<8x128xf32>
    %238 = arith.truncf %219 : vector<8x32xf32> to vector<8x32xbf16>
    %cst_73 = arith.constant dense<0.000000e+00> : vector<8x128xf32>
    %239 = tpu.matmul %238, %6, %cst_73 {dimension_numbers = #tpu.dot_dimension_numbers<[1], [0], [0], [1], [0, 0, 1, 1], [], []>} : vector<8x32xbf16>, vector<32x128xbf16>, vector<8x128xf32> -> vector<8x128xf32>
    %240 = arith.addf %237, %239 : vector<8x128xf32>
    %241 = vector.extract_strided_slice %234 {offsets = [0, 0], sizes = [8, 32], strides = [1, 1]} : vector<8x128xf32> to vector<8x32xf32>
    %242 = arith.negf %241 : vector<8x32xf32>
    %243 = math.exp %242 : vector<8x32xf32>
    %cst_74 = arith.constant 1.000000e+00 : f32
    %244 = vector.broadcast %cst_74 : f32 to vector<8x32xf32>
    %245 = arith.addf %244, %243 : vector<8x32xf32>
    %246 = arith.divf %244, %245 : vector<8x32xf32>
    %247 = vector.extract_strided_slice %234 {offsets = [0, 32], sizes = [8, 32], strides = [1, 1]} : vector<8x128xf32> to vector<8x32xf32>
    %248 = arith.negf %247 : vector<8x32xf32>
    %249 = math.exp %248 : vector<8x32xf32>
    %cst_75 = arith.constant 1.000000e+00 : f32
    %250 = vector.broadcast %cst_75 : f32 to vector<8x32xf32>
    %251 = arith.addf %250, %249 : vector<8x32xf32>
    %252 = arith.divf %250, %251 : vector<8x32xf32>
    %253 = vector.extract_strided_slice %234 {offsets = [0, 64], sizes = [8, 32], strides = [1, 1]} : vector<8x128xf32> to vector<8x32xf32>
    %254 = math.tanh %253 : vector<8x32xf32>
    %255 = vector.extract_strided_slice %234 {offsets = [0, 96], sizes = [8, 32], strides = [1, 1]} : vector<8x128xf32> to vector<8x32xf32>
    %256 = arith.negf %255 : vector<8x32xf32>
    %257 = math.exp %256 : vector<8x32xf32>
    %cst_76 = arith.constant 1.000000e+00 : f32
    %258 = vector.broadcast %cst_76 : f32 to vector<8x32xf32>
    %259 = arith.addf %258, %257 : vector<8x32xf32>
    %260 = arith.divf %258, %259 : vector<8x32xf32>
    %261 = arith.mulf %252, %192 : vector<8x32xf32>
    %262 = arith.mulf %246, %254 : vector<8x32xf32>
    %263 = arith.addf %261, %262 : vector<8x32xf32>
    %264 = math.tanh %263 : vector<8x32xf32>
    %265 = arith.mulf %260, %264 : vector<8x32xf32>
    %266 = vector.extract_strided_slice %240 {offsets = [0, 0], sizes = [8, 32], strides = [1, 1]} : vector<8x128xf32> to vector<8x32xf32>
    %267 = arith.negf %266 : vector<8x32xf32>
    %268 = math.exp %267 : vector<8x32xf32>
    %cst_77 = arith.constant 1.000000e+00 : f32
    %269 = vector.broadcast %cst_77 : f32 to vector<8x32xf32>
    %270 = arith.addf %269, %268 : vector<8x32xf32>
    %271 = arith.divf %269, %270 : vector<8x32xf32>
    %272 = vector.extract_strided_slice %240 {offsets = [0, 32], sizes = [8, 32], strides = [1, 1]} : vector<8x128xf32> to vector<8x32xf32>
    %273 = arith.negf %272 : vector<8x32xf32>
    %274 = math.exp %273 : vector<8x32xf32>
    %cst_78 = arith.constant 1.000000e+00 : f32
    %275 = vector.broadcast %cst_78 : f32 to vector<8x32xf32>
    %276 = arith.addf %275, %274 : vector<8x32xf32>
    %277 = arith.divf %275, %276 : vector<8x32xf32>
    %278 = vector.extract_strided_slice %240 {offsets = [0, 64], sizes = [8, 32], strides = [1, 1]} : vector<8x128xf32> to vector<8x32xf32>
    %279 = math.tanh %278 : vector<8x32xf32>
    %280 = vector.extract_strided_slice %240 {offsets = [0, 96], sizes = [8, 32], strides = [1, 1]} : vector<8x128xf32> to vector<8x32xf32>
    %281 = arith.negf %280 : vector<8x32xf32>
    %282 = math.exp %281 : vector<8x32xf32>
    %cst_79 = arith.constant 1.000000e+00 : f32
    %283 = vector.broadcast %cst_79 : f32 to vector<8x32xf32>
    %284 = arith.addf %283, %282 : vector<8x32xf32>
    %285 = arith.divf %283, %284 : vector<8x32xf32>
    %286 = arith.mulf %277, %217 : vector<8x32xf32>
    %287 = arith.mulf %271, %279 : vector<8x32xf32>
    %288 = arith.addf %286, %287 : vector<8x32xf32>
    %289 = math.tanh %288 : vector<8x32xf32>
    %290 = arith.mulf %285, %289 : vector<8x32xf32>
    %291 = arith.index_cast %c3_i32 : i32 to index
    %c0_80 = arith.constant 0 : index
    %c0_81 = arith.constant 0 : index
    %292 = vector.load %arg4[%291, %c0_80, %c0_81] : memref<8x8x32xf32, #tpu.memory_space<vmem>>, vector<1x8x32xf32>
    %293 = vector.shape_cast %292 : vector<1x8x32xf32> to vector<8x32xf32>
    %294 = vector.shape_cast %265 : vector<8x32xf32> to vector<1x8x32xf32>
    tpu.vector_store %arg4[%291, %c0_80, %c0_81], %294 {strides = array<i32>} : memref<8x8x32xf32, #tpu.memory_space<vmem>>, vector<1x8x32xf32>,
    %295 = arith.index_cast %228 : i32 to index
    %c0_82 = arith.constant 0 : index
    %c0_83 = arith.constant 0 : index
    %296 = vector.load %arg5[%295, %c0_82, %c0_83] : memref<8x8x32xf32, #tpu.memory_space<vmem>>, vector<1x8x32xf32>
    %297 = vector.shape_cast %296 : vector<1x8x32xf32> to vector<8x32xf32>
    %298 = vector.shape_cast %290 : vector<8x32xf32> to vector<1x8x32xf32>
    tpu.vector_store %arg5[%295, %c0_82, %c0_83], %298 {strides = array<i32>} : memref<8x8x32xf32, #tpu.memory_space<vmem>>, vector<1x8x32xf32>,
    %c4_i32 = arith.constant 4 : i32
    %c7_i32_84 = arith.constant 7 : i32
    %299 = arith.subi %c7_i32_84, %c4_i32 : i32
    %300 = arith.index_cast %c4_i32 : i32 to index
    %c0_85 = arith.constant 0 : index
    %c0_86 = arith.constant 0 : index
    %301 = vector.load %arg1[%300, %c0_85, %c0_86] : memref<8x8x128xf32, #tpu.memory_space<vmem>>, vector<1x8x128xf32>
    %302 = vector.shape_cast %301 : vector<1x8x128xf32> to vector<8x128xf32>
    %303 = arith.truncf %265 : vector<8x32xf32> to vector<8x32xbf16>
    %cst_87 = arith.constant dense<0.000000e+00> : vector<8x128xf32>
    %304 = tpu.matmul %303, %4, %cst_87 {dimension_numbers = #tpu.dot_dimension_numbers<[1], [0], [0], [1], [0, 0, 1, 1], [], []>} : vector<8x32xbf16>, vector<32x128xbf16>, vector<8x128xf32> -> vector<8x128xf32>
    %305 = arith.addf %302, %304 : vector<8x128xf32>
    %306 = arith.index_cast %299 : i32 to index
    %c0_88 = arith.constant 0 : index
    %c0_89 = arith.constant 0 : index
    %307 = vector.load %arg2[%306, %c0_88, %c0_89] : memref<8x8x128xf32, #tpu.memory_space<vmem>>, vector<1x8x128xf32>
    %308 = vector.shape_cast %307 : vector<1x8x128xf32> to vector<8x128xf32>
    %309 = arith.truncf %290 : vector<8x32xf32> to vector<8x32xbf16>
    %cst_90 = arith.constant dense<0.000000e+00> : vector<8x128xf32>
    %310 = tpu.matmul %309, %6, %cst_90 {dimension_numbers = #tpu.dot_dimension_numbers<[1], [0], [0], [1], [0, 0, 1, 1], [], []>} : vector<8x32xbf16>, vector<32x128xbf16>, vector<8x128xf32> -> vector<8x128xf32>
    %311 = arith.addf %308, %310 : vector<8x128xf32>
    %312 = vector.extract_strided_slice %305 {offsets = [0, 0], sizes = [8, 32], strides = [1, 1]} : vector<8x128xf32> to vector<8x32xf32>
    %313 = arith.negf %312 : vector<8x32xf32>
    %314 = math.exp %313 : vector<8x32xf32>
    %cst_91 = arith.constant 1.000000e+00 : f32
    %315 = vector.broadcast %cst_91 : f32 to vector<8x32xf32>
    %316 = arith.addf %315, %314 : vector<8x32xf32>
    %317 = arith.divf %315, %316 : vector<8x32xf32>
    %318 = vector.extract_strided_slice %305 {offsets = [0, 32], sizes = [8, 32], strides = [1, 1]} : vector<8x128xf32> to vector<8x32xf32>
    %319 = arith.negf %318 : vector<8x32xf32>
    %320 = math.exp %319 : vector<8x32xf32>
    %cst_92 = arith.constant 1.000000e+00 : f32
    %321 = vector.broadcast %cst_92 : f32 to vector<8x32xf32>
    %322 = arith.addf %321, %320 : vector<8x32xf32>
    %323 = arith.divf %321, %322 : vector<8x32xf32>
    %324 = vector.extract_strided_slice %305 {offsets = [0, 64], sizes = [8, 32], strides = [1, 1]} : vector<8x128xf32> to vector<8x32xf32>
    %325 = math.tanh %324 : vector<8x32xf32>
    %326 = vector.extract_strided_slice %305 {offsets = [0, 96], sizes = [8, 32], strides = [1, 1]} : vector<8x128xf32> to vector<8x32xf32>
    %327 = arith.negf %326 : vector<8x32xf32>
    %328 = math.exp %327 : vector<8x32xf32>
    %cst_93 = arith.constant 1.000000e+00 : f32
    %329 = vector.broadcast %cst_93 : f32 to vector<8x32xf32>
    %330 = arith.addf %329, %328 : vector<8x32xf32>
    %331 = arith.divf %329, %330 : vector<8x32xf32>
    %332 = arith.mulf %323, %263 : vector<8x32xf32>
    %333 = arith.mulf %317, %325 : vector<8x32xf32>
    %334 = arith.addf %332, %333 : vector<8x32xf32>
    %335 = math.tanh %334 : vector<8x32xf32>
    %336 = arith.mulf %331, %335 : vector<8x32xf32>
    %337 = vector.extract_strided_slice %311 {offsets = [0, 0], sizes = [8, 32], strides = [1, 1]} : vector<8x128xf32> to vector<8x32xf32>
    %338 = arith.negf %337 : vector<8x32xf32>
    %339 = math.exp %338 : vector<8x32xf32>
    %cst_94 = arith.constant 1.000000e+00 : f32
    %340 = vector.broadcast %cst_94 : f32 to vector<8x32xf32>
    %341 = arith.addf %340, %339 : vector<8x32xf32>
    %342 = arith.divf %340, %341 : vector<8x32xf32>
    %343 = vector.extract_strided_slice %311 {offsets = [0, 32], sizes = [8, 32], strides = [1, 1]} : vector<8x128xf32> to vector<8x32xf32>
    %344 = arith.negf %343 : vector<8x32xf32>
    %345 = math.exp %344 : vector<8x32xf32>
    %cst_95 = arith.constant 1.000000e+00 : f32
    %346 = vector.broadcast %cst_95 : f32 to vector<8x32xf32>
    %347 = arith.addf %346, %345 : vector<8x32xf32>
    %348 = arith.divf %346, %347 : vector<8x32xf32>
    %349 = vector.extract_strided_slice %311 {offsets = [0, 64], sizes = [8, 32], strides = [1, 1]} : vector<8x128xf32> to vector<8x32xf32>
    %350 = math.tanh %349 : vector<8x32xf32>
    %351 = vector.extract_strided_slice %311 {offsets = [0, 96], sizes = [8, 32], strides = [1, 1]} : vector<8x128xf32> to vector<8x32xf32>
    %352 = arith.negf %351 : vector<8x32xf32>
    %353 = math.exp %352 : vector<8x32xf32>
    %cst_96 = arith.constant 1.000000e+00 : f32
    %354 = vector.broadcast %cst_96 : f32 to vector<8x32xf32>
    %355 = arith.addf %354, %353 : vector<8x32xf32>
    %356 = arith.divf %354, %355 : vector<8x32xf32>
    %357 = arith.mulf %348, %288 : vector<8x32xf32>
    %358 = arith.mulf %342, %350 : vector<8x32xf32>
    %359 = arith.addf %357, %358 : vector<8x32xf32>
    %360 = math.tanh %359 : vector<8x32xf32>
    %361 = arith.mulf %356, %360 : vector<8x32xf32>
    %362 = arith.index_cast %c4_i32 : i32 to index
    %c0_97 = arith.constant 0 : index
    %c0_98 = arith.constant 0 : index
    %363 = vector.load %arg4[%362, %c0_97, %c0_98] : memref<8x8x32xf32, #tpu.memory_space<vmem>>, vector<1x8x32xf32>
    %364 = vector.shape_cast %363 : vector<1x8x32xf32> to vector<8x32xf32>
    %365 = vector.shape_cast %336 : vector<8x32xf32> to vector<1x8x32xf32>
    tpu.vector_store %arg4[%362, %c0_97, %c0_98], %365 {strides = array<i32>} : memref<8x8x32xf32, #tpu.memory_space<vmem>>, vector<1x8x32xf32>,
    %366 = arith.index_cast %299 : i32 to index
    %c0_99 = arith.constant 0 : index
    %c0_100 = arith.constant 0 : index
    %367 = vector.load %arg5[%366, %c0_99, %c0_100] : memref<8x8x32xf32, #tpu.memory_space<vmem>>, vector<1x8x32xf32>
    %368 = vector.shape_cast %367 : vector<1x8x32xf32> to vector<8x32xf32>
    %369 = vector.shape_cast %361 : vector<8x32xf32> to vector<1x8x32xf32>
    tpu.vector_store %arg5[%366, %c0_99, %c0_100], %369 {strides = array<i32>} : memref<8x8x32xf32, #tpu.memory_space<vmem>>, vector<1x8x32xf32>,
    %c5_i32 = arith.constant 5 : i32
    %c7_i32_101 = arith.constant 7 : i32
    %370 = arith.subi %c7_i32_101, %c5_i32 : i32
    %371 = arith.index_cast %c5_i32 : i32 to index
    %c0_102 = arith.constant 0 : index
    %c0_103 = arith.constant 0 : index
    %372 = vector.load %arg1[%371, %c0_102, %c0_103] : memref<8x8x128xf32, #tpu.memory_space<vmem>>, vector<1x8x128xf32>
    %373 = vector.shape_cast %372 : vector<1x8x128xf32> to vector<8x128xf32>
    %374 = arith.truncf %336 : vector<8x32xf32> to vector<8x32xbf16>
    %cst_104 = arith.constant dense<0.000000e+00> : vector<8x128xf32>
    %375 = tpu.matmul %374, %4, %cst_104 {dimension_numbers = #tpu.dot_dimension_numbers<[1], [0], [0], [1], [0, 0, 1, 1], [], []>} : vector<8x32xbf16>, vector<32x128xbf16>, vector<8x128xf32> -> vector<8x128xf32>
    %376 = arith.addf %373, %375 : vector<8x128xf32>
    %377 = arith.index_cast %370 : i32 to index
    %c0_105 = arith.constant 0 : index
    %c0_106 = arith.constant 0 : index
    %378 = vector.load %arg2[%377, %c0_105, %c0_106] : memref<8x8x128xf32, #tpu.memory_space<vmem>>, vector<1x8x128xf32>
    %379 = vector.shape_cast %378 : vector<1x8x128xf32> to vector<8x128xf32>
    %380 = arith.truncf %361 : vector<8x32xf32> to vector<8x32xbf16>
    %cst_107 = arith.constant dense<0.000000e+00> : vector<8x128xf32>
    %381 = tpu.matmul %380, %6, %cst_107 {dimension_numbers = #tpu.dot_dimension_numbers<[1], [0], [0], [1], [0, 0, 1, 1], [], []>} : vector<8x32xbf16>, vector<32x128xbf16>, vector<8x128xf32> -> vector<8x128xf32>
    %382 = arith.addf %379, %381 : vector<8x128xf32>
    %383 = vector.extract_strided_slice %376 {offsets = [0, 0], sizes = [8, 32], strides = [1, 1]} : vector<8x128xf32> to vector<8x32xf32>
    %384 = arith.negf %383 : vector<8x32xf32>
    %385 = math.exp %384 : vector<8x32xf32>
    %cst_108 = arith.constant 1.000000e+00 : f32
    %386 = vector.broadcast %cst_108 : f32 to vector<8x32xf32>
    %387 = arith.addf %386, %385 : vector<8x32xf32>
    %388 = arith.divf %386, %387 : vector<8x32xf32>
    %389 = vector.extract_strided_slice %376 {offsets = [0, 32], sizes = [8, 32], strides = [1, 1]} : vector<8x128xf32> to vector<8x32xf32>
    %390 = arith.negf %389 : vector<8x32xf32>
    %391 = math.exp %390 : vector<8x32xf32>
    %cst_109 = arith.constant 1.000000e+00 : f32
    %392 = vector.broadcast %cst_109 : f32 to vector<8x32xf32>
    %393 = arith.addf %392, %391 : vector<8x32xf32>
    %394 = arith.divf %392, %393 : vector<8x32xf32>
    %395 = vector.extract_strided_slice %376 {offsets = [0, 64], sizes = [8, 32], strides = [1, 1]} : vector<8x128xf32> to vector<8x32xf32>
    %396 = math.tanh %395 : vector<8x32xf32>
    %397 = vector.extract_strided_slice %376 {offsets = [0, 96], sizes = [8, 32], strides = [1, 1]} : vector<8x128xf32> to vector<8x32xf32>
    %398 = arith.negf %397 : vector<8x32xf32>
    %399 = math.exp %398 : vector<8x32xf32>
    %cst_110 = arith.constant 1.000000e+00 : f32
    %400 = vector.broadcast %cst_110 : f32 to vector<8x32xf32>
    %401 = arith.addf %400, %399 : vector<8x32xf32>
    %402 = arith.divf %400, %401 : vector<8x32xf32>
    %403 = arith.mulf %394, %334 : vector<8x32xf32>
    %404 = arith.mulf %388, %396 : vector<8x32xf32>
    %405 = arith.addf %403, %404 : vector<8x32xf32>
    %406 = math.tanh %405 : vector<8x32xf32>
    %407 = arith.mulf %402, %406 : vector<8x32xf32>
    %408 = vector.extract_strided_slice %382 {offsets = [0, 0], sizes = [8, 32], strides = [1, 1]} : vector<8x128xf32> to vector<8x32xf32>
    %409 = arith.negf %408 : vector<8x32xf32>
    %410 = math.exp %409 : vector<8x32xf32>
    %cst_111 = arith.constant 1.000000e+00 : f32
    %411 = vector.broadcast %cst_111 : f32 to vector<8x32xf32>
    %412 = arith.addf %411, %410 : vector<8x32xf32>
    %413 = arith.divf %411, %412 : vector<8x32xf32>
    %414 = vector.extract_strided_slice %382 {offsets = [0, 32], sizes = [8, 32], strides = [1, 1]} : vector<8x128xf32> to vector<8x32xf32>
    %415 = arith.negf %414 : vector<8x32xf32>
    %416 = math.exp %415 : vector<8x32xf32>
    %cst_112 = arith.constant 1.000000e+00 : f32
    %417 = vector.broadcast %cst_112 : f32 to vector<8x32xf32>
    %418 = arith.addf %417, %416 : vector<8x32xf32>
    %419 = arith.divf %417, %418 : vector<8x32xf32>
    %420 = vector.extract_strided_slice %382 {offsets = [0, 64], sizes = [8, 32], strides = [1, 1]} : vector<8x128xf32> to vector<8x32xf32>
    %421 = math.tanh %420 : vector<8x32xf32>
    %422 = vector.extract_strided_slice %382 {offsets = [0, 96], sizes = [8, 32], strides = [1, 1]} : vector<8x128xf32> to vector<8x32xf32>
    %423 = arith.negf %422 : vector<8x32xf32>
    %424 = math.exp %423 : vector<8x32xf32>
    %cst_113 = arith.constant 1.000000e+00 : f32
    %425 = vector.broadcast %cst_113 : f32 to vector<8x32xf32>
    %426 = arith.addf %425, %424 : vector<8x32xf32>
    %427 = arith.divf %425, %426 : vector<8x32xf32>
    %428 = arith.mulf %419, %359 : vector<8x32xf32>
    %429 = arith.mulf %413, %421 : vector<8x32xf32>
    %430 = arith.addf %428, %429 : vector<8x32xf32>
    %431 = math.tanh %430 : vector<8x32xf32>
    %432 = arith.mulf %427, %431 : vector<8x32xf32>
    %433 = arith.index_cast %c5_i32 : i32 to index
    %c0_114 = arith.constant 0 : index
    %c0_115 = arith.constant 0 : index
    %434 = vector.load %arg4[%433, %c0_114, %c0_115] : memref<8x8x32xf32, #tpu.memory_space<vmem>>, vector<1x8x32xf32>
    %435 = vector.shape_cast %434 : vector<1x8x32xf32> to vector<8x32xf32>
    %436 = vector.shape_cast %407 : vector<8x32xf32> to vector<1x8x32xf32>
    tpu.vector_store %arg4[%433, %c0_114, %c0_115], %436 {strides = array<i32>} : memref<8x8x32xf32, #tpu.memory_space<vmem>>, vector<1x8x32xf32>,
    %437 = arith.index_cast %370 : i32 to index
    %c0_116 = arith.constant 0 : index
    %c0_117 = arith.constant 0 : index
    %438 = vector.load %arg5[%437, %c0_116, %c0_117] : memref<8x8x32xf32, #tpu.memory_space<vmem>>, vector<1x8x32xf32>
    %439 = vector.shape_cast %438 : vector<1x8x32xf32> to vector<8x32xf32>
    %440 = vector.shape_cast %432 : vector<8x32xf32> to vector<1x8x32xf32>
    tpu.vector_store %arg5[%437, %c0_116, %c0_117], %440 {strides = array<i32>} : memref<8x8x32xf32, #tpu.memory_space<vmem>>, vector<1x8x32xf32>,
    %c6_i32 = arith.constant 6 : i32
    %c7_i32_118 = arith.constant 7 : i32
    %441 = arith.subi %c7_i32_118, %c6_i32 : i32
    %442 = arith.index_cast %c6_i32 : i32 to index
    %c0_119 = arith.constant 0 : index
    %c0_120 = arith.constant 0 : index
    %443 = vector.load %arg1[%442, %c0_119, %c0_120] : memref<8x8x128xf32, #tpu.memory_space<vmem>>, vector<1x8x128xf32>
    %444 = vector.shape_cast %443 : vector<1x8x128xf32> to vector<8x128xf32>
    %445 = arith.truncf %407 : vector<8x32xf32> to vector<8x32xbf16>
    %cst_121 = arith.constant dense<0.000000e+00> : vector<8x128xf32>
    %446 = tpu.matmul %445, %4, %cst_121 {dimension_numbers = #tpu.dot_dimension_numbers<[1], [0], [0], [1], [0, 0, 1, 1], [], []>} : vector<8x32xbf16>, vector<32x128xbf16>, vector<8x128xf32> -> vector<8x128xf32>
    %447 = arith.addf %444, %446 : vector<8x128xf32>
    %448 = arith.index_cast %441 : i32 to index
    %c0_122 = arith.constant 0 : index
    %c0_123 = arith.constant 0 : index
    %449 = vector.load %arg2[%448, %c0_122, %c0_123] : memref<8x8x128xf32, #tpu.memory_space<vmem>>, vector<1x8x128xf32>
    %450 = vector.shape_cast %449 : vector<1x8x128xf32> to vector<8x128xf32>
    %451 = arith.truncf %432 : vector<8x32xf32> to vector<8x32xbf16>
    %cst_124 = arith.constant dense<0.000000e+00> : vector<8x128xf32>
    %452 = tpu.matmul %451, %6, %cst_124 {dimension_numbers = #tpu.dot_dimension_numbers<[1], [0], [0], [1], [0, 0, 1, 1], [], []>} : vector<8x32xbf16>, vector<32x128xbf16>, vector<8x128xf32> -> vector<8x128xf32>
    %453 = arith.addf %450, %452 : vector<8x128xf32>
    %454 = vector.extract_strided_slice %447 {offsets = [0, 0], sizes = [8, 32], strides = [1, 1]} : vector<8x128xf32> to vector<8x32xf32>
    %455 = arith.negf %454 : vector<8x32xf32>
    %456 = math.exp %455 : vector<8x32xf32>
    %cst_125 = arith.constant 1.000000e+00 : f32
    %457 = vector.broadcast %cst_125 : f32 to vector<8x32xf32>
    %458 = arith.addf %457, %456 : vector<8x32xf32>
    %459 = arith.divf %457, %458 : vector<8x32xf32>
    %460 = vector.extract_strided_slice %447 {offsets = [0, 32], sizes = [8, 32], strides = [1, 1]} : vector<8x128xf32> to vector<8x32xf32>
    %461 = arith.negf %460 : vector<8x32xf32>
    %462 = math.exp %461 : vector<8x32xf32>
    %cst_126 = arith.constant 1.000000e+00 : f32
    %463 = vector.broadcast %cst_126 : f32 to vector<8x32xf32>
    %464 = arith.addf %463, %462 : vector<8x32xf32>
    %465 = arith.divf %463, %464 : vector<8x32xf32>
    %466 = vector.extract_strided_slice %447 {offsets = [0, 64], sizes = [8, 32], strides = [1, 1]} : vector<8x128xf32> to vector<8x32xf32>
    %467 = math.tanh %466 : vector<8x32xf32>
    %468 = vector.extract_strided_slice %447 {offsets = [0, 96], sizes = [8, 32], strides = [1, 1]} : vector<8x128xf32> to vector<8x32xf32>
    %469 = arith.negf %468 : vector<8x32xf32>
    %470 = math.exp %469 : vector<8x32xf32>
    %cst_127 = arith.constant 1.000000e+00 : f32
    %471 = vector.broadcast %cst_127 : f32 to vector<8x32xf32>
    %472 = arith.addf %471, %470 : vector<8x32xf32>
    %473 = arith.divf %471, %472 : vector<8x32xf32>
    %474 = arith.mulf %465, %405 : vector<8x32xf32>
    %475 = arith.mulf %459, %467 : vector<8x32xf32>
    %476 = arith.addf %474, %475 : vector<8x32xf32>
    %477 = math.tanh %476 : vector<8x32xf32>
    %478 = arith.mulf %473, %477 : vector<8x32xf32>
    %479 = vector.extract_strided_slice %453 {offsets = [0, 0], sizes = [8, 32], strides = [1, 1]} : vector<8x128xf32> to vector<8x32xf32>
    %480 = arith.negf %479 : vector<8x32xf32>
    %481 = math.exp %480 : vector<8x32xf32>
    %cst_128 = arith.constant 1.000000e+00 : f32
    %482 = vector.broadcast %cst_128 : f32 to vector<8x32xf32>
    %483 = arith.addf %482, %481 : vector<8x32xf32>
    %484 = arith.divf %482, %483 : vector<8x32xf32>
    %485 = vector.extract_strided_slice %453 {offsets = [0, 32], sizes = [8, 32], strides = [1, 1]} : vector<8x128xf32> to vector<8x32xf32>
    %486 = arith.negf %485 : vector<8x32xf32>
    %487 = math.exp %486 : vector<8x32xf32>
    %cst_129 = arith.constant 1.000000e+00 : f32
    %488 = vector.broadcast %cst_129 : f32 to vector<8x32xf32>
    %489 = arith.addf %488, %487 : vector<8x32xf32>
    %490 = arith.divf %488, %489 : vector<8x32xf32>
    %491 = vector.extract_strided_slice %453 {offsets = [0, 64], sizes = [8, 32], strides = [1, 1]} : vector<8x128xf32> to vector<8x32xf32>
    %492 = math.tanh %491 : vector<8x32xf32>
    %493 = vector.extract_strided_slice %453 {offsets = [0, 96], sizes = [8, 32], strides = [1, 1]} : vector<8x128xf32> to vector<8x32xf32>
    %494 = arith.negf %493 : vector<8x32xf32>
    %495 = math.exp %494 : vector<8x32xf32>
    %cst_130 = arith.constant 1.000000e+00 : f32
    %496 = vector.broadcast %cst_130 : f32 to vector<8x32xf32>
    %497 = arith.addf %496, %495 : vector<8x32xf32>
    %498 = arith.divf %496, %497 : vector<8x32xf32>
    %499 = arith.mulf %490, %430 : vector<8x32xf32>
    %500 = arith.mulf %484, %492 : vector<8x32xf32>
    %501 = arith.addf %499, %500 : vector<8x32xf32>
    %502 = math.tanh %501 : vector<8x32xf32>
    %503 = arith.mulf %498, %502 : vector<8x32xf32>
    %504 = arith.index_cast %c6_i32 : i32 to index
    %c0_131 = arith.constant 0 : index
    %c0_132 = arith.constant 0 : index
    %505 = vector.load %arg4[%504, %c0_131, %c0_132] : memref<8x8x32xf32, #tpu.memory_space<vmem>>, vector<1x8x32xf32>
    %506 = vector.shape_cast %505 : vector<1x8x32xf32> to vector<8x32xf32>
    %507 = vector.shape_cast %478 : vector<8x32xf32> to vector<1x8x32xf32>
    tpu.vector_store %arg4[%504, %c0_131, %c0_132], %507 {strides = array<i32>} : memref<8x8x32xf32, #tpu.memory_space<vmem>>, vector<1x8x32xf32>,
    %508 = arith.index_cast %441 : i32 to index
    %c0_133 = arith.constant 0 : index
    %c0_134 = arith.constant 0 : index
    %509 = vector.load %arg5[%508, %c0_133, %c0_134] : memref<8x8x32xf32, #tpu.memory_space<vmem>>, vector<1x8x32xf32>
    %510 = vector.shape_cast %509 : vector<1x8x32xf32> to vector<8x32xf32>
    %511 = vector.shape_cast %503 : vector<8x32xf32> to vector<1x8x32xf32>
    tpu.vector_store %arg5[%508, %c0_133, %c0_134], %511 {strides = array<i32>} : memref<8x8x32xf32, #tpu.memory_space<vmem>>, vector<1x8x32xf32>,
    %c7_i32_135 = arith.constant 7 : i32
    %c7_i32_136 = arith.constant 7 : i32
    %512 = arith.subi %c7_i32_136, %c7_i32_135 : i32
    %513 = arith.index_cast %c7_i32_135 : i32 to index
    %c0_137 = arith.constant 0 : index
    %c0_138 = arith.constant 0 : index
    %514 = vector.load %arg1[%513, %c0_137, %c0_138] : memref<8x8x128xf32, #tpu.memory_space<vmem>>, vector<1x8x128xf32>
    %515 = vector.shape_cast %514 : vector<1x8x128xf32> to vector<8x128xf32>
    %516 = arith.truncf %478 : vector<8x32xf32> to vector<8x32xbf16>
    %cst_139 = arith.constant dense<0.000000e+00> : vector<8x128xf32>
    %517 = tpu.matmul %516, %4, %cst_139 {dimension_numbers = #tpu.dot_dimension_numbers<[1], [0], [0], [1], [0, 0, 1, 1], [], []>} : vector<8x32xbf16>, vector<32x128xbf16>, vector<8x128xf32> -> vector<8x128xf32>
    %518 = arith.addf %515, %517 : vector<8x128xf32>
    %519 = arith.index_cast %512 : i32 to index
    %c0_140 = arith.constant 0 : index
    %c0_141 = arith.constant 0 : index
    %520 = vector.load %arg2[%519, %c0_140, %c0_141] : memref<8x8x128xf32, #tpu.memory_space<vmem>>, vector<1x8x128xf32>
    %521 = vector.shape_cast %520 : vector<1x8x128xf32> to vector<8x128xf32>
    %522 = arith.truncf %503 : vector<8x32xf32> to vector<8x32xbf16>
    %cst_142 = arith.constant dense<0.000000e+00> : vector<8x128xf32>
    %523 = tpu.matmul %522, %6, %cst_142 {dimension_numbers = #tpu.dot_dimension_numbers<[1], [0], [0], [1], [0, 0, 1, 1], [], []>} : vector<8x32xbf16>, vector<32x128xbf16>, vector<8x128xf32> -> vector<8x128xf32>
    %524 = arith.addf %521, %523 : vector<8x128xf32>
    %525 = vector.extract_strided_slice %518 {offsets = [0, 0], sizes = [8, 32], strides = [1, 1]} : vector<8x128xf32> to vector<8x32xf32>
    %526 = arith.negf %525 : vector<8x32xf32>
    %527 = math.exp %526 : vector<8x32xf32>
    %cst_143 = arith.constant 1.000000e+00 : f32
    %528 = vector.broadcast %cst_143 : f32 to vector<8x32xf32>
    %529 = arith.addf %528, %527 : vector<8x32xf32>
    %530 = arith.divf %528, %529 : vector<8x32xf32>
    %531 = vector.extract_strided_slice %518 {offsets = [0, 32], sizes = [8, 32], strides = [1, 1]} : vector<8x128xf32> to vector<8x32xf32>
    %532 = arith.negf %531 : vector<8x32xf32>
    %533 = math.exp %532 : vector<8x32xf32>
    %cst_144 = arith.constant 1.000000e+00 : f32
    %534 = vector.broadcast %cst_144 : f32 to vector<8x32xf32>
    %535 = arith.addf %534, %533 : vector<8x32xf32>
    %536 = arith.divf %534, %535 : vector<8x32xf32>
    %537 = vector.extract_strided_slice %518 {offsets = [0, 64], sizes = [8, 32], strides = [1, 1]} : vector<8x128xf32> to vector<8x32xf32>
    %538 = math.tanh %537 : vector<8x32xf32>
    %539 = vector.extract_strided_slice %518 {offsets = [0, 96], sizes = [8, 32], strides = [1, 1]} : vector<8x128xf32> to vector<8x32xf32>
    %540 = arith.negf %539 : vector<8x32xf32>
    %541 = math.exp %540 : vector<8x32xf32>
    %cst_145 = arith.constant 1.000000e+00 : f32
    %542 = vector.broadcast %cst_145 : f32 to vector<8x32xf32>
    %543 = arith.addf %542, %541 : vector<8x32xf32>
    %544 = arith.divf %542, %543 : vector<8x32xf32>
    %545 = arith.mulf %536, %476 : vector<8x32xf32>
    %546 = arith.mulf %530, %538 : vector<8x32xf32>
    %547 = arith.addf %545, %546 : vector<8x32xf32>
    %548 = math.tanh %547 : vector<8x32xf32>
    %549 = arith.mulf %544, %548 : vector<8x32xf32>
    %550 = vector.extract_strided_slice %524 {offsets = [0, 0], sizes = [8, 32], strides = [1, 1]} : vector<8x128xf32> to vector<8x32xf32>
    %551 = arith.negf %550 : vector<8x32xf32>
    %552 = math.exp %551 : vector<8x32xf32>
    %cst_146 = arith.constant 1.000000e+00 : f32
    %553 = vector.broadcast %cst_146 : f32 to vector<8x32xf32>
    %554 = arith.addf %553, %552 : vector<8x32xf32>
    %555 = arith.divf %553, %554 : vector<8x32xf32>
    %556 = vector.extract_strided_slice %524 {offsets = [0, 32], sizes = [8, 32], strides = [1, 1]} : vector<8x128xf32> to vector<8x32xf32>
    %557 = arith.negf %556 : vector<8x32xf32>
    %558 = math.exp %557 : vector<8x32xf32>
    %cst_147 = arith.constant 1.000000e+00 : f32
    %559 = vector.broadcast %cst_147 : f32 to vector<8x32xf32>
    %560 = arith.addf %559, %558 : vector<8x32xf32>
    %561 = arith.divf %559, %560 : vector<8x32xf32>
    %562 = vector.extract_strided_slice %524 {offsets = [0, 64], sizes = [8, 32], strides = [1, 1]} : vector<8x128xf32> to vector<8x32xf32>
    %563 = math.tanh %562 : vector<8x32xf32>
    %564 = vector.extract_strided_slice %524 {offsets = [0, 96], sizes = [8, 32], strides = [1, 1]} : vector<8x128xf32> to vector<8x32xf32>
    %565 = arith.negf %564 : vector<8x32xf32>
    %566 = math.exp %565 : vector<8x32xf32>
    %cst_148 = arith.constant 1.000000e+00 : f32
    %567 = vector.broadcast %cst_148 : f32 to vector<8x32xf32>
    %568 = arith.addf %567, %566 : vector<8x32xf32>
    %569 = arith.divf %567, %568 : vector<8x32xf32>
    %570 = arith.mulf %561, %501 : vector<8x32xf32>
    %571 = arith.mulf %555, %563 : vector<8x32xf32>
    %572 = arith.addf %570, %571 : vector<8x32xf32>
    %573 = math.tanh %572 : vector<8x32xf32>
    %574 = arith.mulf %569, %573 : vector<8x32xf32>
    %575 = arith.index_cast %c7_i32_135 : i32 to index
    %c0_149 = arith.constant 0 : index
    %c0_150 = arith.constant 0 : index
    %576 = vector.load %arg4[%575, %c0_149, %c0_150] : memref<8x8x32xf32, #tpu.memory_space<vmem>>, vector<1x8x32xf32>
    %577 = vector.shape_cast %576 : vector<1x8x32xf32> to vector<8x32xf32>
    %578 = vector.shape_cast %549 : vector<8x32xf32> to vector<1x8x32xf32>
    tpu.vector_store %arg4[%575, %c0_149, %c0_150], %578 {strides = array<i32>} : memref<8x8x32xf32, #tpu.memory_space<vmem>>, vector<1x8x32xf32>,
    %579 = arith.index_cast %512 : i32 to index
    %c0_151 = arith.constant 0 : index
    %c0_152 = arith.constant 0 : index
    %580 = vector.load %arg5[%579, %c0_151, %c0_152] : memref<8x8x32xf32, #tpu.memory_space<vmem>>, vector<1x8x32xf32>
    %581 = vector.shape_cast %580 : vector<1x8x32xf32> to vector<8x32xf32>
    %582 = vector.shape_cast %574 : vector<8x32xf32> to vector<1x8x32xf32>
    tpu.vector_store %arg5[%579, %c0_151, %c0_152], %582 {strides = array<i32>} : memref<8x8x32xf32, #tpu.memory_space<vmem>>, vector<1x8x32xf32>,
    %c8_i32 = arith.constant 8 : i32
    %c0_153 = arith.constant 0 : index
    %c0_154 = arith.constant 0 : index
    %c0_155 = arith.constant 0 : index
    %583 = vector.load %arg6[%c0_153, %c0_154, %c0_155] : memref<2x8x32xf32, #tpu.memory_space<vmem>>, vector<1x8x32xf32>
    %584 = vector.shape_cast %583 : vector<1x8x32xf32> to vector<8x32xf32>
    %585 = vector.shape_cast %549 : vector<8x32xf32> to vector<1x8x32xf32>
    tpu.vector_store %arg6[%c0_153, %c0_154, %c0_155], %585 {strides = array<i32>} : memref<2x8x32xf32, #tpu.memory_space<vmem>>, vector<1x8x32xf32>,
    %c0_156 = arith.constant 0 : index
    %c0_157 = arith.constant 0 : index
    %c0_158 = arith.constant 0 : index
    %586 = vector.load %arg7[%c0_156, %c0_157, %c0_158] : memref<2x8x32xf32, #tpu.memory_space<vmem>>, vector<1x8x32xf32>
    %587 = vector.shape_cast %586 : vector<1x8x32xf32> to vector<8x32xf32>
    %588 = vector.shape_cast %547 : vector<8x32xf32> to vector<1x8x32xf32>
    tpu.vector_store %arg7[%c0_156, %c0_157, %c0_158], %588 {strides = array<i32>} : memref<2x8x32xf32, #tpu.memory_space<vmem>>, vector<1x8x32xf32>,
    %c1_159 = arith.constant 1 : index
    %c0_160 = arith.constant 0 : index
    %c0_161 = arith.constant 0 : index
    %589 = vector.load %arg6[%c1_159, %c0_160, %c0_161] : memref<2x8x32xf32, #tpu.memory_space<vmem>>, vector<1x8x32xf32>
    %590 = vector.shape_cast %589 : vector<1x8x32xf32> to vector<8x32xf32>
    %591 = vector.shape_cast %574 : vector<8x32xf32> to vector<1x8x32xf32>
    tpu.vector_store %arg6[%c1_159, %c0_160, %c0_161], %591 {strides = array<i32>} : memref<2x8x32xf32, #tpu.memory_space<vmem>>, vector<1x8x32xf32>,
    %c1_162 = arith.constant 1 : index
    %c0_163 = arith.constant 0 : index
    %c0_164 = arith.constant 0 : index
    %592 = vector.load %arg7[%c1_162, %c0_163, %c0_164] : memref<2x8x32xf32, #tpu.memory_space<vmem>>, vector<1x8x32xf32>
    %593 = vector.shape_cast %592 : vector<1x8x32xf32> to vector<8x32xf32>
    %594 = vector.shape_cast %572 : vector<8x32xf32> to vector<1x8x32xf32>
    tpu.vector_store %arg7[%c1_162, %c0_163, %c0_164], %594 {strides = array<i32>} : memref<2x8x32xf32, #tpu.memory_space<vmem>>, vector<1x8x32xf32>,
    return
  }
  func.func @transform_0(%arg0: i32) -> (i32, i32, i32) {
    %c0_i32 = arith.constant 0 : i32
    %c0_i32_0 = arith.constant 0 : i32
    %c0_i32_1 = arith.constant 0 : i32
    return %arg0, %c0_i32, %c0_i32_0 : i32, i32, i32
  }
  func.func @transform_1(%arg0: i32) -> (i32, i32, i32) {
    %c1_i32 = arith.constant 1 : i32
    %0 = arith.subi %c1_i32, %arg0 : i32
    %c0_i32 = arith.constant 0 : i32
    %c0_i32_0 = arith.constant 0 : i32
    %c0_i32_1 = arith.constant 0 : i32
    return %0, %c0_i32, %c0_i32_0 : i32, i32, i32
  }
  func.func @transform_2(%arg0: i32) -> (i32, i32, i32) {
    %c0_i32 = arith.constant 0 : i32
    %c0_i32_0 = arith.constant 0 : i32
    %c0_i32_1 = arith.constant 0 : i32
    %c0_i32_2 = arith.constant 0 : i32
    return %c0_i32, %c0_i32_0, %c0_i32_1 : i32, i32, i32
  }
  func.func @transform_3(%arg0: i32) -> (i32, i32, i32) {
    %c0_i32 = arith.constant 0 : i32
    %c0_i32_0 = arith.constant 0 : i32
    %c0_i32_1 = arith.constant 0 : i32
    return %arg0, %c0_i32, %c0_i32_0 : i32, i32, i32
  }
  func.func @transform_4(%arg0: i32) -> (i32, i32, i32) {
    %c1_i32 = arith.constant 1 : i32
    %0 = arith.subi %c1_i32, %arg0 : i32
    %c0_i32 = arith.constant 0 : i32
    %c0_i32_0 = arith.constant 0 : i32
    %c0_i32_1 = arith.constant 0 : i32
    return %0, %c0_i32, %c0_i32_0 : i32, i32, i32
  }
}

module attributes {stable_mosaic.version = 11 : i64} {
  func.func @_gate_proj_kernel_2(%arg0: i32, %arg1: memref<8x8x32xf32, #tpu.memory_space<vmem>>, %arg2: memref<8x8x32xf32, #tpu.memory_space<vmem>>, %arg3: memref<2x32x256xbf16, #tpu.memory_space<vmem>>, %arg4: memref<1x256xf32, #tpu.memory_space<vmem>>, %arg5: memref<8x8x128xf32, #tpu.memory_space<vmem>>, %arg6: memref<8x8x128xf32, #tpu.memory_space<vmem>>) attributes {dimension_semantics = [#tpu.dimension_semantics<parallel>], iteration_bounds = array<i64: 2>, scalar_prefetch = 0 : i64, scratch_operands = 0 : i64, tpu.core_type = #tpu.core_type<tc>, window_params = [{transform_indices = @transform_0, window_bounds = array<i64: 8, 8, 32>}, {transform_indices = @transform_1, window_bounds = array<i64: 8, 8, 32>}, {pipeline_mode = #tpu.pipeline_mode<synchronous>, transform_indices = @transform_2, window_bounds = array<i64: 2, 32, 256>}, {pipeline_mode = #tpu.pipeline_mode<synchronous>, transform_indices = @transform_3, window_bounds = array<i64: 1, 256>}, {transform_indices = @transform_4, window_bounds = array<i64: 8, 8, 128>}, {transform_indices = @transform_5, window_bounds = array<i64: 8, 8, 128>}]} {
    %c0 = arith.constant 0 : index
    %c0_0 = arith.constant 0 : index
    %c0_1 = arith.constant 0 : index
    %0 = vector.load %arg1[%c0, %c0_0, %c0_1] : memref<8x8x32xf32, #tpu.memory_space<vmem>>, vector<8x8x32xf32>
    %c0_2 = arith.constant 0 : index
    %c0_3 = arith.constant 0 : index
    %c0_4 = arith.constant 0 : index
    %1 = vector.load %arg2[%c0_2, %c0_3, %c0_4] : memref<8x8x32xf32, #tpu.memory_space<vmem>>, vector<8x8x32xf32>
    %2 = vector.shape_cast %0 : vector<8x8x32xf32> to vector<64x32xf32>
    %3 = arith.truncf %2 : vector<64x32xf32> to vector<64x32xbf16>
    %c0_5 = arith.constant 0 : index
    %c0_6 = arith.constant 0 : index
    %c0_7 = arith.constant 0 : index
    %4 = vector.load %arg3[%c0_5, %c0_6, %c0_7] : memref<2x32x256xbf16, #tpu.memory_space<vmem>>, vector<1x32x256xbf16>
    %5 = vector.shape_cast %4 : vector<1x32x256xbf16> to vector<32x256xbf16>
    %cst = arith.constant dense<0.000000e+00> : vector<64x256xf32>
    %6 = tpu.matmul %3, %5, %cst {dimension_numbers = #tpu.dot_dimension_numbers<[1], [0], [0], [1], [0, 0, 1, 1], [], []>} : vector<64x32xbf16>, vector<32x256xbf16>, vector<64x256xf32> -> vector<64x256xf32>
    %7 = vector.shape_cast %1 : vector<8x8x32xf32> to vector<64x32xf32>
    %8 = arith.truncf %7 : vector<64x32xf32> to vector<64x32xbf16>
    %c1 = arith.constant 1 : index
    %c0_8 = arith.constant 0 : index
    %c0_9 = arith.constant 0 : index
    %9 = vector.load %arg3[%c1, %c0_8, %c0_9] : memref<2x32x256xbf16, #tpu.memory_space<vmem>>, vector<1x32x256xbf16>
    %10 = vector.shape_cast %9 : vector<1x32x256xbf16> to vector<32x256xbf16>
    %cst_10 = arith.constant dense<0.000000e+00> : vector<64x256xf32>
    %11 = tpu.matmul %8, %10, %cst_10 {dimension_numbers = #tpu.dot_dimension_numbers<[1], [0], [0], [1], [0, 0, 1, 1], [], []>} : vector<64x32xbf16>, vector<32x256xbf16>, vector<64x256xf32> -> vector<64x256xf32>
    %12 = arith.addf %6, %11 : vector<64x256xf32>
    %c0_11 = arith.constant 0 : index
    %c0_12 = arith.constant 0 : index
    %13 = vector.load %arg4[%c0_11, %c0_12] : memref<1x256xf32, #tpu.memory_space<vmem>>, vector<1x256xf32>
    %14 = vector.broadcast %13 : vector<1x256xf32> to vector<64x256xf32>
    %15 = arith.addf %12, %14 : vector<64x256xf32>
    %16 = vector.extract_strided_slice %15 {offsets = [0, 0], sizes = [64, 128], strides = [1, 1]} : vector<64x256xf32> to vector<64x128xf32>
    %17 = vector.shape_cast %16 : vector<64x128xf32> to vector<8x8x128xf32>
    %c0_13 = arith.constant 0 : index
    %c0_14 = arith.constant 0 : index
    %c0_15 = arith.constant 0 : index
    %18 = vector.load %arg5[%c0_13, %c0_14, %c0_15] : memref<8x8x128xf32, #tpu.memory_space<vmem>>, vector<8x8x128xf32>
    tpu.vector_store %arg5[%c0_13, %c0_14, %c0_15], %17 {strides = array<i32>} : memref<8x8x128xf32, #tpu.memory_space<vmem>>, vector<8x8x128xf32>,
    %19 = vector.extract_strided_slice %15 {offsets = [0, 128], sizes = [64, 128], strides = [1, 1]} : vector<64x256xf32> to vector<64x128xf32>
    %20 = vector.shape_cast %19 : vector<64x128xf32> to vector<8x8x128xf32>
    %c0_16 = arith.constant 0 : index
    %c0_17 = arith.constant 0 : index
    %c0_18 = arith.constant 0 : index
    %21 = vector.load %arg6[%c0_16, %c0_17, %c0_18] : memref<8x8x128xf32, #tpu.memory_space<vmem>>, vector<8x8x128xf32>
    tpu.vector_store %arg6[%c0_16, %c0_17, %c0_18], %20 {strides = array<i32>} : memref<8x8x128xf32, #tpu.memory_space<vmem>>, vector<8x8x128xf32>,
    return
  }
  func.func @transform_0(%arg0: i32) -> (i32, i32, i32) {
    %c0_i32 = arith.constant 0 : i32
    %c0_i32_0 = arith.constant 0 : i32
    %c0_i32_1 = arith.constant 0 : i32
    return %arg0, %c0_i32, %c0_i32_0 : i32, i32, i32
  }
  func.func @transform_1(%arg0: i32) -> (i32, i32, i32) {
    %c0_i32 = arith.constant 0 : i32
    %c0_i32_0 = arith.constant 0 : i32
    %c0_i32_1 = arith.constant 0 : i32
    return %arg0, %c0_i32, %c0_i32_0 : i32, i32, i32
  }
  func.func @transform_2(%arg0: i32) -> (i32, i32, i32) {
    %c0_i32 = arith.constant 0 : i32
    %c0_i32_0 = arith.constant 0 : i32
    %c0_i32_1 = arith.constant 0 : i32
    %c0_i32_2 = arith.constant 0 : i32
    return %c0_i32, %c0_i32_0, %c0_i32_1 : i32, i32, i32
  }
  func.func @transform_3(%arg0: i32) -> (i32, i32) {
    %c0_i32 = arith.constant 0 : i32
    %c0_i32_0 = arith.constant 0 : i32
    %c0_i32_1 = arith.constant 0 : i32
    return %c0_i32, %c0_i32_0 : i32, i32
  }
  func.func @transform_4(%arg0: i32) -> (i32, i32, i32) {
    %c0_i32 = arith.constant 0 : i32
    %c0_i32_0 = arith.constant 0 : i32
    %c0_i32_1 = arith.constant 0 : i32
    return %arg0, %c0_i32, %c0_i32_0 : i32, i32, i32
  }
  func.func @transform_5(%arg0: i32) -> (i32, i32, i32) {
    %c0_i32 = arith.constant 0 : i32
    %c0_i32_0 = arith.constant 0 : i32
    %c0_i32_1 = arith.constant 0 : i32
    return %arg0, %c0_i32, %c0_i32_0 : i32, i32, i32
  }
}

</mosaic_0001>

<bundles_post_ra>
// kernel: bilstms_forward.4
= control target key start
LH: loop header
LB: loop body
LE: loop exit
PB: predicated region body
PF: predicated region fallthrough
CT: control target
= control target key end

     0   :  { %s530_s15 = smov 0   ;;  %s594_s0 = inlined_call_operand.vmem [shape: f32[16,8,32], index: 0, kind: input, shape index: {}]   ;;  %s595_s1 = inlined_call_operand.vmem [shape: bf16[1,32,256], index: 1, kind: input, shape index: {}]   ;;  %s596_s2 = inlined_call_operand.vmem [shape: f32[1,256], index: 2, kind: input, shape index: {}]   ;;  %s597_s3 = inlined_call_operand.vmem [shape: f32[16,8,128], index: 3, kind: output, shape index: {0}]   ;;  %s598_s4 = inlined_call_operand.vmem [shape: f32[16,8,128], index: 4, kind: output, shape index: {1}]  }
   0x1 LB: > { %s456_s16 = sadd.s32 4294967295, %s502_s15   ;;  %p460_p0 = scmp.ge.s32.totalorder %s502_s15, 1  ;;  %s502_s15 = sphi %s530_s15, %s15_s15  }
   0x2   : > { %p166_p1 = scmp.lt.s32.totalorder %s502_s15, 3 }
   0x4   : > { %p167_p2 = pnand %p460_p0, %p166_p1 }
   0x5   : > { %v490_v0 = vld [vmem:[%s595_s1 + $0x4] ss:$8 sps:$4 sm:$0xff] (!%p167_p2)   ;;  %s461_s19 = sshll.u32 (!%p167_p2), %s456_s16, 3  ;;  %v492_v1 = vld [vmem:[%s595_s1] ss:$8 sps:$4 sm:$0xff] (!%p167_p2)   ;;  %v504_v2 = vmov (!%p167_p2), 0   ;;  %v234_v17 = vlaneseq (!%p167_p2) }
   0x6   : > { %170 = sbr.rel (%p167_p2) target bundleno = 246 (0xf6), region = 32  ;;  %309 = vmatprep.mubr.bf16.mxu0 (!%p167_p2), %v504_v2  ;;  %329 = vmatprep.mubr.bf16.mxu1 (!%p167_p2), %v504_v2  ;;  %p198_p3 = scmp.lt.s32.totalorder (!%p167_p2), %s461_s19, 15  ;;  %v493_v3 = vld [vmem:[%s595_s1 + $0x14] ss:$8 sps:$4 sm:$0xff] (!%p167_p2)   ;;  %v495_v4 = vld [vmem:[%s595_s1 + $0x10] ss:$8 sps:$4 sm:$0xff] (!%p167_p2)  }
   0x7   : > { %277 = vmatprep.subr.bf16.mxu0 (!%p167_p2), %v490_v0  ;;  %477 = vmatprep.subr.bf16.mxu1 (!%p167_p2), %v490_v0  ;;  %vm264_vm0 = vcmask (!%p167_p2), 261120   ;;  %v235_v18 = vshrl.u32 (!%p167_p2), %v234_v17, 7  ;;  %v232_v20 = vld [vmem:[%s596_s2] sm:$0x3] (!%p167_p2) }
   0x8   : > { %278 = vmatpush1.bf16.msra.mxu0 (!%p167_p2), %v492_v1  ;;  %479 = vmatpush1.bf16.msra.mxu1 (!%p167_p2), %v492_v1 }
   0x9   : > { %279 = vmatprep.subr.bf16.mxu0 (!%p167_p2), %v493_v3  ;;  %478 = vmatprep.subr.bf16.mxu1 (!%p167_p2), %v493_v3  ;;  %v236_v19 = vsub.s32 (!%p167_p2), 0, %v235_v18  ;;  %v240_v21 = vsub.s32 (!%p167_p2), 1, %v235_v18 }
   0xb   : > { %v237_v22 = vrot.slane (!%p167_p2), %v232_v20, %v236_v19  ;;  %v241_v23 = vrot.slane (!%p167_p2), %v232_v20, %v240_v21 }
   0xc   : > { %280 = vmatpush1.bf16.msra.mxu0 (!%p167_p2), %v495_v4  ;;  %480 = vmatpush1.bf16.msra.mxu1 (!%p167_p2), %v495_v4 }
   0xd   : > { %s600_s19 = smov (!%p198_p3, %s461_s19), 15 }
   0xe   : > { %s550_s26 = sshll.u32 %s600_s19, 3 }
   0xf   : > { %s201_s29 = scalar_lea.vmem %s594_s0, %s550_s26  ;;  %s567_s8 = scalar_lea.vmem %s597_s3, %s550_s26 }
  0x10   : > { %v216_v5 = vld [vmem:[%s201_s29] sm:$0xff]  ;;  %v217_v6 = vld [vmem:[%s201_s29 + $0x8] sm:$0xff]  ;;  %v218_v11 = vld [vmem:[%s201_s29 + $0x10] sm:$0xff]  ;;  %s573_s11 = scalar_lea.vmem %s598_s4, %s550_s26 }
  0x11   : > { %v220_v7 = vld [vmem:[%s201_s29 + $0x20] sm:$0xff]  ;;  %v224_v8 = vpack.c.bf16 %v217_v6, %v216_v5  ;;  %v221_v9 = vld [vmem:[%s201_s29 + $0x28] sm:$0xff]  ;;  %v219_v12 = vld [vmem:[%s201_s29 + $0x18] sm:$0xff] }
  0x12   : > { %v226_v10 = vpack.c.bf16 %v221_v9, %v220_v7  ;;  %v222_v13 = vld [vmem:[%s201_s29 + $0x30] sm:$0xff]  ;;  %v223_v14 = vld [vmem:[%s201_s29 + $0x38] sm:$0xff]  ;;  %v225_v15 = vpack.c.bf16 %v219_v12, %v218_v11 }
  0x13   : > { %471 = vmatmul.mubr.msk.bf16.vlgmr.msra.gmra.mrb[0].mxu0 %vm264_vm0, %v224_v8  ;;  %v227_v16 = vpack.c.bf16 %v223_v14, %v222_v13 }
  0x14   : > { %473 = vmatmul.mubr.msk.bf16.vlgmr.msra.gmra.mrb[0].mxu1 %vm264_vm0, %v226_v10  ;;  %319 = vmatprep.mubr.bf16.mxu0 %v504_v2 }
  0x15   : > { %339 = vmatprep.mubr.bf16.mxu1 %v504_v2 }
  0x1b   : > { %472 = vmatmul.mubr.msk.bf16.gmra.mrb[4].mxu0 %vm264_vm0, %v225_v15 }
  0x1c   : > { %474 = vmatmul.mubr.msk.bf16.gmra.mrb[4].mxu1 %vm264_vm0, %v227_v16 }
  0xe6   : > { %v311_v24 = vpop.f32.mrb[0].mxu0 }
  0xe7   : > { %v312_v25 = vadd.f32 %v311_v24, %v237_v22  ;;  %v331_v26 = vpop.f32.mrb[0].mxu1  ;;  %v313_v27 = vpop.f32.mrb[1].mxu0 }
  0xe8   : > { %v332_v28 = vadd.f32 %v331_v26, %v237_v22  ;;  %v314_v29 = vadd.f32 %v313_v27, %v241_v23  ;;  %v333_v30 = vpop.f32.mrb[1].mxu1  ;;  %v315_v31 = vpop.f32.mrb[2].mxu0 }
  0xe9   : > { %350 = vst [vmem:[%s567_s8] sm:$0xff] %v312_v25  ;;  %v334_v32 = vadd.f32 %v333_v30, %v241_v23  ;;  %v316_v33 = vadd.f32 %v315_v31, %v237_v22  ;;  %v335_v34 = vpop.f32.mrb[2].mxu1  ;;  %v317_v35 = vpop.f32.mrb[3].mxu0 }
  0xea   : > { %354 = vst [vmem:[%s567_s8 + $0x20] sm:$0xff] %v332_v28  ;;  %358 = vst [vmem:[%s573_s11] sm:$0xff] %v314_v29  ;;  %v336_v36 = vadd.f32 %v335_v34, %v237_v22  ;;  %v318_v37 = vadd.f32 %v317_v35, %v241_v23  ;;  %v337_v38 = vpop.f32.mrb[3].mxu1 }
  0xeb   : > { %362 = vst [vmem:[%s573_s11 + $0x20] sm:$0xff] %v334_v32  ;;  %351 = vst [vmem:[%s567_s8 + $0x8] sm:$0xff] %v316_v33  ;;  %v338_v39 = vadd.f32 %v337_v38, %v241_v23 }
  0xec   : > { %355 = vst [vmem:[%s567_s8 + $0x28] sm:$0xff] %v336_v36  ;;  %359 = vst [vmem:[%s573_s11 + $0x8] sm:$0xff] %v318_v37 }
  0xed   : > { %363 = vst [vmem:[%s573_s11 + $0x28] sm:$0xff] %v338_v39 }
  0xee   : > { %v321_v40 = vpop.f32.mrb[4].mxu0 }
  0xef   : > { %v322_v41 = vadd.f32 %v321_v40, %v237_v22  ;;  %v341_v42 = vpop.f32.mrb[4].mxu1  ;;  %v323_v43 = vpop.f32.mrb[5].mxu0 }
  0xf0   : > { %v342_v44 = vadd.f32 %v341_v42, %v237_v22  ;;  %v324_v45 = vadd.f32 %v323_v43, %v241_v23  ;;  %v343_v46 = vpop.f32.mrb[5].mxu1  ;;  %v325_v47 = vpop.f32.mrb[6].mxu0 }
  0xf1   : > { %352 = vst [vmem:[%s567_s8 + $0x10] sm:$0xff] %v322_v41  ;;  %v344_v48 = vadd.f32 %v343_v46, %v241_v23  ;;  %v326_v49 = vadd.f32 %v325_v47, %v237_v22  ;;  %v345_v50 = vpop.f32.mrb[6].mxu1  ;;  %v327_v51 = vpop.f32.mrb[7].mxu0 }
  0xf2   : > { %356 = vst [vmem:[%s567_s8 + $0x30] sm:$0xff] %v342_v44  ;;  %360 = vst [vmem:[%s573_s11 + $0x10] sm:$0xff] %v324_v45  ;;  %v346_v52 = vadd.f32 %v345_v50, %v237_v22  ;;  %v328_v53 = vadd.f32 %v327_v51, %v241_v23  ;;  %v347_v54 = vpop.f32.mrb[7].mxu1 }
  0xf3   : > { %364 = vst [vmem:[%s573_s11 + $0x30] sm:$0xff] %v344_v48  ;;  %353 = vst [vmem:[%s567_s8 + $0x18] sm:$0xff] %v326_v49  ;;  %v348_v55 = vadd.f32 %v347_v54, %v241_v23 }
  0xf4   : > { %357 = vst [vmem:[%s567_s8 + $0x38] sm:$0xff] %v346_v52  ;;  %361 = vst [vmem:[%s573_s11 + $0x18] sm:$0xff] %v328_v53 }
  0xf5   : > { %365 = vst [vmem:[%s573_s11 + $0x38] sm:$0xff] %v348_v55 }
  0xf6 PF: > { %s15_s15 = sadd.s32 1, %s502_s15  }
  0xf7   : > { %p12_p4 = scmp.ge.s32.totalorder %s15_s15, 4  }
  0xf9   :  { %14 = sbr.rel (!%p12_p4) target bundleno = 1 (0x1), region = 74 }

// kernel: bilstms_forward.6
= control target key start
LH: loop header
LB: loop body
LE: loop exit
PB: predicated region body
PF: predicated region fallthrough
CT: control target
= control target key end

     0   :  { %s766_s18 = smov 0   ;;  %s890_s0 = inlined_call_operand.vmem [shape: f32[16,8,32], index: 0, kind: input, shape index: {}]   ;;  %s891_s1 = inlined_call_operand.vmem [shape: f32[16,8,32], index: 1, kind: input, shape index: {}]   ;;  %s892_s2 = inlined_call_operand.vmem [shape: bf16[2,32,256], index: 2, kind: input, shape index: {}]   ;;  %s893_s3 = inlined_call_operand.vmem [shape: f32[1,256], index: 3, kind: input, shape index: {}]   ;;  %s894_s4 = inlined_call_operand.vmem [shape: f32[16,8,128], index: 4, kind: output, shape index: {0}]   ;;  %s895_s5 = inlined_call_operand.vmem [shape: f32[16,8,128], index: 5, kind: output, shape index: {1}]  }
   0x1 LB: > { %s655_s19 = sadd.s32 4294967295, %s733_s18   ;;  %p659_p0 = scmp.ge.s32.totalorder %s733_s18, 1  ;;  %s733_s18 = sphi %s766_s18, %s16_s18  }
   0x2   : > { %p202_p1 = scmp.lt.s32.totalorder %s733_s18, 3 }
   0x4   : > { %p203_p2 = pnand %p659_p0, %p202_p1 }
   0x5   : > { %v715_v0 = vld [vmem:[%s892_s2 + $0x24] ss:$8 sps:$4 sm:$0xff] (!%p203_p2)   ;;  %s660_s22 = sshll.u32 (!%p203_p2), %s655_s19, 3  ;;  %v735_v2 = vmov (!%p203_p2), 0   ;;  %v719_v3 = vld [vmem:[%s892_s2 + $0x20] ss:$8 sps:$4 sm:$0xff] (!%p203_p2)   ;;  %v511_v33 = vlaneseq (!%p203_p2) }
   0x6   : > { %206 = sbr.rel (%p203_p2) target bundleno = 264 (0x108), region = 36  ;;  %v717_v1 = vld [vmem:[%s892_s2 + $0x4] ss:$8 sps:$4 sm:$0xff] (!%p203_p2)   ;;  %363 = vmatprep.mubr.bf16.mxu1 (!%p203_p2), %v735_v2  ;;  %468 = vmatprep.mubr.bf16.mxu0 (!%p203_p2), %v735_v2  ;;  %p241_p3 = scmp.lt.s32.totalorder (!%p203_p2), %s660_s22, 15  ;;  %v720_v4 = vld [vmem:[%s892_s2] ss:$8 sps:$4 sm:$0xff] (!%p203_p2)  }
   0x7   : > { %331 = vmatprep.subr.bf16.mxu1 (!%p203_p2), %v715_v0  ;;  %436 = vmatprep.subr.bf16.mxu0 (!%p203_p2), %v717_v1  ;;  %v721_v5 = vld [vmem:[%s892_s2 + $0x34] ss:$8 sps:$4 sm:$0xff] (!%p203_p2)   ;;  %v725_v7 = vld [vmem:[%s892_s2 + $0x30] ss:$8 sps:$4 sm:$0xff] (!%p203_p2)   ;;  %vm318_vm0 = vcmask (!%p203_p2), 261120   ;;  %v512_v34 = vshrl.u32 (!%p203_p2), %v511_v33, 7 }
   0x8   : > { %332 = vmatpush1.bf16.msra.mxu1 (!%p203_p2), %v719_v3  ;;  %437 = vmatpush1.bf16.msra.mxu0 (!%p203_p2), %v720_v4  ;;  %v723_v6 = vld [vmem:[%s892_s2 + $0x14] ss:$8 sps:$4 sm:$0xff] (!%p203_p2)   ;;  %v726_v8 = vld [vmem:[%s892_s2 + $0x10] ss:$8 sps:$4 sm:$0xff] (!%p203_p2)   ;;  %v509_v36 = vld [vmem:[%s893_s3] sm:$0x3] (!%p203_p2) }
   0x9   : > { %333 = vmatprep.subr.bf16.mxu1 (!%p203_p2), %v721_v5  ;;  %438 = vmatprep.subr.bf16.mxu0 (!%p203_p2), %v723_v6  ;;  %v513_v35 = vsub.s32 (!%p203_p2), 0, %v512_v34  ;;  %v517_v37 = vsub.s32 (!%p203_p2), 1, %v512_v34 }
   0xb   : > { %v839_v38 = vrot.slane (!%p203_p2), %v509_v36, %v513_v35  ;;  %v841_v41 = vrot.slane (!%p203_p2), %v509_v36, %v517_v37 }
   0xc   : > { %334 = vmatpush1.bf16.msra.mxu1 (!%p203_p2), %v725_v7  ;;  %439 = vmatpush1.bf16.msra.mxu0 (!%p203_p2), %v726_v8 }
   0xd   : > { %s897_s22 = smov (!%p241_p3, %s660_s22), 15 }
   0xe   : > { %s798_s12 = sshll.u32 %s897_s22, 3 }
   0xf   : > { %s804_s15 = scalar_lea.vmem %s891_s1, %s798_s12  ;;  %s810_s19 = scalar_lea.vmem %s890_s0, %s798_s12 }
  0x10   : > { %v273_v9 = vld [vmem:[%s804_s15] sm:$0xff]  ;;  %v274_v10 = vld [vmem:[%s804_s15 + $0x8] sm:$0xff]  ;;  %v275_v15 = vld [vmem:[%s804_s15 + $0x10] sm:$0xff]  ;;  %s847_s24 = scalar_lea.vmem %s894_s4, %s798_s12  ;;  %s854_s27 = scalar_lea.vmem %s895_s5, %s798_s12 }
  0x11   : > { %v265_v11 = vld [vmem:[%s810_s19] sm:$0xff]  ;;  %v289_v12 = vpack.c.bf16 %v274_v10, %v273_v9  ;;  %v266_v13 = vld [vmem:[%s810_s19 + $0x8] sm:$0xff]  ;;  %v276_v16 = vld [vmem:[%s804_s15 + $0x18] sm:$0xff] }
  0x12   : > { %v281_v14 = vpack.c.bf16 %v266_v13, %v265_v11  ;;  %v267_v17 = vld [vmem:[%s810_s19 + $0x10] sm:$0xff]  ;;  %v268_v18 = vld [vmem:[%s810_s19 + $0x18] sm:$0xff]  ;;  %v290_v19 = vpack.c.bf16 %v276_v16, %v275_v15  ;;  %v277_v21 = vld [vmem:[%s804_s15 + $0x20] sm:$0xff] }
  0x13   : > { %676 = vmatmul.mubr.msk.bf16.vlgmr.msra.gmra.mrb[0].mxu1 %vm318_vm0, %v289_v12  ;;  %v282_v20 = vpack.c.bf16 %v268_v18, %v267_v17  ;;  %v278_v22 = vld [vmem:[%s804_s15 + $0x28] sm:$0xff]  ;;  %v269_v23 = vld [vmem:[%s810_s19 + $0x20] sm:$0xff]  ;;  %v279_v27 = vld [vmem:[%s804_s15 + $0x30] sm:$0xff] }
  0x14   : > { %684 = vmatmul.mubr.msk.bf16.vlgmr.msra.gmra.mrb[0].mxu0 %vm318_vm0, %v281_v14  ;;  %373 = vmatprep.mubr.bf16.mxu1 %v735_v2  ;;  %v270_v24 = vld [vmem:[%s810_s19 + $0x28] sm:$0xff]  ;;  %v291_v25 = vpack.c.bf16 %v278_v22, %v277_v21  ;;  %v280_v28 = vld [vmem:[%s804_s15 + $0x38] sm:$0xff]  ;;  %v271_v29 = vld [vmem:[%s810_s19 + $0x30] sm:$0xff] }
  0x15   : > { %478 = vmatprep.mubr.bf16.mxu0 %v735_v2  ;;  %v283_v26 = vpack.c.bf16 %v270_v24, %v269_v23  ;;  %v272_v30 = vld [vmem:[%s810_s19 + $0x38] sm:$0xff]  ;;  %v292_v31 = vpack.c.bf16 %v280_v28, %v279_v27 }
  0x16   : > { %v284_v32 = vpack.c.bf16 %v272_v30, %v271_v29 }
  0x1b   : > { %677 = vmatmul.mubr.msk.bf16.gmra.mrb[4].mxu1 %vm318_vm0, %v290_v19 }
  0x1c   : > { %685 = vmatmul.mubr.msk.bf16.gmra.mrb[4].mxu0 %vm318_vm0, %v282_v20  ;;  %383 = vmatprep.mubr.bf16.mxu1 %v735_v2 }
  0x1d   : > { %488 = vmatprep.mubr.bf16.mxu0 %v735_v2 }
  0x23   : > { %678 = vmatmul.mubr.msk.bf16.gmra.mrb[8].mxu1 %vm318_vm0, %v291_v25 }
  0x24   : > { %686 = vmatmul.mubr.msk.bf16.gmra.mrb[8].mxu0 %vm318_vm0, %v283_v26  ;;  %393 = vmatprep.mubr.bf16.mxu1 %v735_v2 }
  0x25   : > { %498 = vmatprep.mubr.bf16.mxu0 %v735_v2 }
  0x2b   : > { %679 = vmatmul.mubr.msk.bf16.gmra.mrb[12].mxu1 %vm318_vm0, %v292_v31 }
  0x2c   : > { %687 = vmatmul.mubr.msk.bf16.gmra.mrb[12].mxu0 %vm318_vm0, %v284_v32 }
  0xe6   : > { %v365_v39 = vpop.f32.mrb[0].mxu1 }
  0xe7   : > { %v470_v40 = vpop.f32.mrb[0].mxu0  ;;  %v367_v43 = vpop.f32.mrb[1].mxu1 }
  0xe8   : > { %v471_v42 = vadd.f32 %v470_v40, %v365_v39  ;;  %v472_v44 = vpop.f32.mrb[1].mxu0  ;;  %v369_v46 = vpop.f32.mrb[2].mxu1 }
  0xe9   : > { %v473_v45 = vadd.f32 %v472_v44, %v367_v43  ;;  %v474_v47 = vpop.f32.mrb[2].mxu0  ;;  %v371_v50 = vpop.f32.mrb[3].mxu1 }
  0xea   : > { %v521_v48 = vadd.f32 %v839_v38, %v471_v42  ;;  %v475_v49 = vadd.f32 %v474_v47, %v369_v46  ;;  %v476_v51 = vpop.f32.mrb[3].mxu0 }
  0xeb   : > { %v522_v52 = vadd.f32 %v841_v41, %v473_v45  ;;  %v477_v53 = vadd.f32 %v476_v51, %v371_v50 }
  0xec   : > { %537 = vst [vmem:[%s847_s24] sm:$0xff] %v521_v48  ;;  %v523_v54 = vadd.f32 %v839_v38, %v475_v49 }
  0xed   : > { %545 = vst [vmem:[%s854_s27] sm:$0xff] %v522_v52  ;;  %v524_v55 = vadd.f32 %v841_v41, %v477_v53 }
  0xee   : > { %538 = vst [vmem:[%s847_s24 + $0x8] sm:$0xff] %v523_v54  ;;  %v375_v56 = vpop.f32.mrb[4].mxu1 }
  0xef   : > { %546 = vst [vmem:[%s854_s27 + $0x8] sm:$0xff] %v524_v55  ;;  %v480_v57 = vpop.f32.mrb[4].mxu0  ;;  %v377_v59 = vpop.f32.mrb[5].mxu1 }
  0xf0   : > { %v481_v58 = vadd.f32 %v480_v57, %v375_v56  ;;  %v482_v60 = vpop.f32.mrb[5].mxu0  ;;  %v379_v62 = vpop.f32.mrb[6].mxu1 }
  0xf1   : > { %v483_v61 = vadd.f32 %v482_v60, %v377_v59  ;;  %v484_v63 = vpop.f32.mrb[6].mxu0  ;;  %v381_v2 = vpop.f32.mrb[7].mxu1 }
  0xf2   : > { %v525_v0 = vadd.f32 %v839_v38, %v481_v58  ;;  %v485_v1 = vadd.f32 %v484_v63, %v379_v62  ;;  %v486_v3 = vpop.f32.mrb[7].mxu0 }
  0xf3   : > { %v526_v4 = vadd.f32 %v841_v41, %v483_v61  ;;  %v487_v5 = vadd.f32 %v486_v3, %v381_v2 }
  0xf4   : > { %539 = vst [vmem:[%s847_s24 + $0x10] sm:$0xff] %v525_v0  ;;  %v527_v6 = vadd.f32 %v839_v38, %v485_v1 }
  0xf5   : > { %547 = vst [vmem:[%s854_s27 + $0x10] sm:$0xff] %v526_v4  ;;  %v528_v7 = vadd.f32 %v841_v41, %v487_v5 }
  0xf6   : > { %540 = vst [vmem:[%s847_s24 + $0x18] sm:$0xff] %v527_v6  ;;  %v385_v8 = vpop.f32.mrb[8].mxu1 }
  0xf7   : > { %548 = vst [vmem:[%s854_s27 + $0x18] sm:$0xff] %v528_v7  ;;  %v490_v9 = vpop.f32.mrb[8].mxu0  ;;  %v387_v11 = vpop.f32.mrb[9].mxu1 }
  0xf8   : > { %v491_v10 = vadd.f32 %v490_v9, %v385_v8  ;;  %v492_v12 = vpop.f32.mrb[9].mxu0  ;;  %v389_v14 = vpop.f32.mrb[10].mxu1 }
  0xf9   : > { %v493_v13 = vadd.f32 %v492_v12, %v387_v11  ;;  %v494_v15 = vpop.f32.mrb[10].mxu0  ;;  %v391_v18 = vpop.f32.mrb[11].mxu1 }
  0xfa   : > { %v529_v16 = vadd.f32 %v839_v38, %v491_v10  ;;  %v495_v17 = vadd.f32 %v494_v15, %v389_v14  ;;  %v496_v19 = vpop.f32.mrb[11].mxu0 }
  0xfb   : > { %v530_v20 = vadd.f32 %v841_v41, %v493_v13  ;;  %v497_v21 = vadd.f32 %v496_v19, %v391_v18 }
  0xfc   : > { %541 = vst [vmem:[%s847_s24 + $0x20] sm:$0xff] %v529_v16  ;;  %v531_v22 = vadd.f32 %v839_v38, %v495_v17 }
  0xfd   : > { %549 = vst [vmem:[%s854_s27 + $0x20] sm:$0xff] %v530_v20  ;;  %v532_v23 = vadd.f32 %v841_v41, %v497_v21 }
  0xfe   : > { %542 = vst [vmem:[%s847_s24 + $0x28] sm:$0xff] %v531_v22  ;;  %v395_v24 = vpop.f32.mrb[12].mxu1 }
  0xff   : > { %550 = vst [vmem:[%s854_s27 + $0x28] sm:$0xff] %v532_v23  ;;  %v500_v25 = vpop.f32.mrb[12].mxu0  ;;  %v397_v27 = vpop.f32.mrb[13].mxu1 }
 0x100   : > { %v501_v26 = vadd.f32 %v500_v25, %v395_v24  ;;  %v502_v28 = vpop.f32.mrb[13].mxu0  ;;  %v399_v30 = vpop.f32.mrb[14].mxu1 }
 0x101   : > { %v503_v29 = vadd.f32 %v502_v28, %v397_v27  ;;  %v504_v31 = vpop.f32.mrb[14].mxu0  ;;  %v401_v34 = vpop.f32.mrb[15].mxu1 }
 0x102   : > { %v533_v32 = vadd.f32 %v839_v38, %v501_v26  ;;  %v505_v33 = vadd.f32 %v504_v31, %v399_v30  ;;  %v506_v35 = vpop.f32.mrb[15].mxu0 }
 0x103   : > { %v534_v36 = vadd.f32 %v841_v41, %v503_v29  ;;  %v507_v37 = vadd.f32 %v506_v35, %v401_v34 }
 0x104   : > { %543 = vst [vmem:[%s847_s24 + $0x30] sm:$0xff] %v533_v32  ;;  %v535_v39 = vadd.f32 %v839_v38, %v505_v33 }
 0x105   : > { %551 = vst [vmem:[%s854_s27 + $0x30] sm:$0xff] %v534_v36  ;;  %v536_v40 = vadd.f32 %v841_v41, %v507_v37 }
 0x106   : > { %544 = vst [vmem:[%s847_s24 + $0x38] sm:$0xff] %v535_v39 }
 0x107   : > { %552 = vst [vmem:[%s854_s27 + $0x38] sm:$0xff] %v536_v40 }
 0x108 PF: > { %s16_s18 = sadd.s32 1, %s733_s18  }
 0x109   : > { %p13_p4 = scmp.ge.s32.totalorder %s16_s18, 4  }
 0x10b   :  { %15 = sbr.rel (!%p13_p4) target bundleno = 1 (0x1), region = 82 }

// kernel: bilstms_forward.5
= control target key start
LH: loop header
LB: loop body
LE: loop exit
PB: predicated region body
PF: predicated region fallthrough
CT: control target
= control target key end

     0   :  { %s2139_s15 = smov 0   ;;  %s2552_s0 = inlined_call_operand.vmem [shape: f32[16,8,128], index: 0, kind: input, shape index: {}]   ;;  %s2553_s1 = inlined_call_operand.vmem [shape: f32[16,8,128], index: 1, kind: input, shape index: {}]   ;;  %s2554_s2 = inlined_call_operand.vmem [shape: bf16[2,32,128], index: 2, kind: input, shape index: {}]   ;;  %s2555_s3 = inlined_call_operand.vmem [shape: f32[16,8,32], index: 3, kind: output, shape index: {0}]   ;;  %s2556_s4 = inlined_call_operand.vmem [shape: f32[16,8,32], index: 4, kind: output, shape index: {1}]  }
   0x1 LB: > { %s1694_s16 = sadd.s32 4294967295, %s2106_s15   ;;  %p1698_p0 = scmp.ge.s32.totalorder %s2106_s15, 1  ;;  %s2106_s15 = sphi %s2139_s15, %s15_s15  }
   0x2   : > { %p183_p1 = scmp.lt.s32.totalorder %s2106_s15, 3 }
   0x4   : > { %p184_p2 = pnand %p1698_p0, %p183_p1 }
   0x5   : > { %s1699_s17 = sshll.u32 (!%p184_p2), %s1694_s16, 3  ;;  %s227_s18 = ssub.s32 (!%p184_p2), 1, %s1694_s16 }
   0x6   : > { %187 = sbr.rel (%p184_p2) target bundleno = 5672 (0x1628), region = 32  ;;  %p222_p3 = scmp.lt.s32.totalorder (!%p184_p2), %s1699_s17, 15 }
   0x7   : > { %s1701_s19 = sshll.u32 (!%p184_p2), %s227_s18, 3  ;;  %p1707_p5 = scmp.ne.s32.totalorder (!%p184_p2), %s1694_s16, 0 }
   0x8   : > { %p229_p4 = scmp.lt.s32.totalorder (!%p184_p2), %s1701_s19, 15 }
   0xd   : > { %s2558_s17 = smov (!%p222_p3, %s1699_s17), 15  ;;  %s2560_s19 = smov (!%p229_p4, %s1701_s19), 15 }
   0xe   : > { %s1700_s20 = sshll.u32 %s2558_s17, 3  ;;  %s1702_s24 = sshll.u32 %s2560_s19, 3  ;;  %vm254_vm0 = vcmask (!%p1707_p5), 261120   ;;  %v2108_v0 = vmov (!%p1707_p5), 0.0  }
   0xf   : > { %s2150_s23 = scalar_lea.vmem %s2552_s0, %s1700_s20  ;;  %s2155_s27 = scalar_lea.vmem %s2553_s1, %s1702_s24  ;;  %255 = vst.msk [vmem:[#allocation2] sm:$0xff] (!%p1707_p5), %vm254_vm0, %v2108_v0  ;;  %256 = vst.msk [vmem:[#allocation2 + $0x8] sm:$0xff] (!%p1707_p5), %vm254_vm0, %v2108_v0 }
  0x10   : > { %s2160_s30 = scalar_lea.vmem %s2555_s3, %s1700_s20  ;;  %s2165_s7 = scalar_lea.vmem %s2556_s4, %s1702_s24  ;;  %257 = vst.msk [vmem:[#allocation3] sm:$0xff] (!%p1707_p5), %vm254_vm0, %v2108_v0  ;;  %258 = vst.msk [vmem:[#allocation3 + $0x8] sm:$0xff] (!%p1707_p5), %vm254_vm0, %v2108_v0 }
  0x11   : > { %253 = sbr.rel (%p1707_p5) target bundleno = 24 (0x18), region = 36 }
  0x18 PF: > { %v2170_v1 = vld [vmem:[%s2554_s2] sm:$0xff]   ;;  %v2109_v2 = vmov 0.0   ;;  %v2177_v3 = vld [vmem:[%s2554_s2 + $0x10] sm:$0xff]   ;;  %v2183_v4 = vld [vmem:[%s2554_s2 + $0x8] sm:$0xff]   ;;  %vm2110_vm1 = vmmov 0   ;;  %s2111_s17 = smov 32  }
  0x19   : > { %1826 = vmatprep.subr.bf16.mxu0 %v2109_v2  ;;  %1834 = vmatprep.subr.bf16.mxu1 %v2109_v2  ;;  %v2192_v5 = vld [vmem:[%s2554_s2 + $0x18] sm:$0xff]   ;;  %v268_v6 = vld [vmem:[#allocation2] sm:$0xff]  ;;  %v271_v7 = vld [vmem:[#allocation2 + $0x8] sm:$0xff]  ;;  %vm288_vm2 = vcmask 261120   ;;  %s2112_s18 = smov 64   ;;  %s2113_s19 = smov 96  }
  0x1a   : > { %1827 = vmatpush3.bf16.msra.mxu0 %v2170_v1  ;;  %1830 = vmatprep.mubr.msk.bf16.mxu0 %vm2110_vm1, %v2109_v2  ;;  %v269_v8 = vld [vmem:[#allocation3] sm:$0xff]  ;;  %v275_v9 = vpack.c.bf16 %v268_v6, %v268_v6  ;;  %v335_v10 = vpack.c.bf16 %v271_v7, %v271_v7  ;;  %v273_v11 = vld [vmem:[#allocation3 + $0x8] sm:$0xff]  ;;  %v274_v12 = vld [vmem:[%s2150_s23] sm:$0xff] }
  0x1b   : > { %1835 = vmatpush3.bf16.msra.mxu1 %v2177_v3  ;;  %1828 = vmatprep.subr.bf16.mxu0 %v2109_v2  ;;  %v1715_v13 = vld [vmem:[%s2155_s27 + $0x38] sm:$0xff]  ;;  %v1722_v56 = vld [vmem:[%s2150_s23 + $0x8] sm:$0xff]  ;;  %v1724_v61 = vld [vmem:[%s2155_s27 + $0x30] sm:$0xff] }
  0x1c   : > { %1836 = vmatprep.subr.bf16.mxu1 %v2109_v2  ;;  %1838 = vmatprep.mubr.msk.bf16.mxu1 %vm2110_vm1, %v2109_v2 }
  0x1d   : > { %400 = vrot.lane.b32.xlu1 %v269_v8, %s2111_s17 }
  0x1e   : > { %1829 = vmatpush3.bf16.msra.mxu0 %v2183_v4 }
  0x1f   : > { %1837 = vmatpush3.bf16.msra.mxu1 %v2192_v5  ;;  %1842 = vmatprep.subr.bf16.mxu0 %v2109_v2 }
  0x20   : > { %1850 = vmatprep.subr.bf16.mxu1 %v2109_v2 }
  0x21   : > { %1831 = vmatmul.mubr.msk.bf16.vlgmr.msra.gmra.mrb[0].mxu0 %vm288_vm2, %v275_v9  ;;  %428 = vrot.lane.b32.xlu1 %v273_v11, %s2111_s17 }
  0x22   : > { %1839 = vmatmul.mubr.msk.bf16.vlgmr.msra.gmra.mrb[0].mxu1 %vm288_vm2, %v335_v10  ;;  %1843 = vmatpush3.bf16.msra.mxu0 %v2170_v1 }
  0x23   : > { %1844 = vmatprep.subr.bf16.mxu0 %v2109_v2  ;;  %1851 = vmatpush3.bf16.msra.mxu1 %v2177_v3 }
  0x24   : > { %1846 = vmatprep.mubr.msk.bf16.mxu0 %vm2110_vm1, %v2109_v2  ;;  %1852 = vmatprep.subr.bf16.mxu1 %v2109_v2 }
  0x25   : > { %1854 = vmatprep.mubr.msk.bf16.mxu1 %vm2110_vm1, %v2109_v2 }
  0x26   : > { %1845 = vmatpush3.bf16.msra.mxu0 %v2183_v4 }
  0x27   : > { %1853 = vmatpush3.bf16.msra.mxu1 %v2192_v5  ;;  %1858 = vmatprep.subr.bf16.mxu0 %v2109_v2 }
  0x28   : > { %1866 = vmatprep.subr.bf16.mxu1 %v2109_v2 }
  0x8f   : > { %v401_v38 = vpop.permute.xlu1 %400 }
  0x93   : > { %v429_v40 = vpop.permute.xlu1 %428 }
  0xf4   : > { %v326_v14 = vpop.f32.mrb[0].mxu0 }
  0xf5   : > { %v332_v15 = vadd.f32 %v326_v14, %v274_v12  ;;  %v1832_v16 = vpop.f32.mrb[1].mxu0  ;;  %v385_v17 = vpop.f32.mrb[0].mxu1 }
  0xf6   : > { %v391_v18 = vadd.f32 %v1715_v13, %v385_v17  ;;  %v329_v19 = vpop.f32.mrb[2].mxu0  ;;  %v1840_v20 = vpop.f32.mrb[1].mxu1 }
  0xf7   : > { %1972 = vtanh.f32 %v332_v15  ;;  %v1833_v21 = vpop.f32.mrb[3].mxu0  ;;  %v388_v22 = vpop.f32.mrb[2].mxu1  ;;  %v1719_v26 = vmul.f32 -1.442695, %v332_v15 }
  0xf8   : > { %v1841_v23 = vpop.f32.mrb[3].mxu1  ;;  %1974 = vtanh.f32 %v391_v18  ;;  %v1720_v27 = vmul.f32 -1.442695, %v391_v18 }
  0xf9   : > { %1976 = vpow2.f32 %v1719_v26 }
  0xfa   : > { %1978 = vpow2.f32 %v1720_v27 }
 0x101   : > { %v1973_v24 = vpop.eup %1972 }
 0x102   : > { %405 = vrot.lane.b32.xlu0 %v1973_v24, %s2112_s18  ;;  %v1975_v25 = vpop.eup %1974 }
 0x103   : > { %v1977_v28 = vpop.eup %1976 }
 0x104   : > { %v395_v29 = vadd.f32 1.0, %v1977_v28  ;;  %v1979_v30 = vpop.eup %1978 }
 0x105   : > { %v423_v31 = vadd.f32 1.0, %v1979_v30 }
 0x106   : > { %433 = vrot.lane.b32.xlu0 %v1975_v25, %s2112_s18  ;;  %1980 = vrcp.f32 %v395_v29 }
 0x107   : > { %1982 = vrcp.f32 %v423_v31 }
 0x110   : > { %v1981_v32 = vpop.eup %1980 }
 0x111   : > { %v1983_v35 = vpop.eup %1982  ;;  %v403_v39 = vmul.f32 %v1981_v32, %v401_v38 }
 0x112   : > { %v431_v43 = vmul.f32 %v1983_v35, %v429_v40 }
 0x174   : > { %v406_v33 = vpop.permute.xlu0 %405 }
 0x175   : > { %v408_v34 = vmul.f32 %v1981_v32, %v406_v33 }
 0x177   : > { %410 = vrot.lane.b32.xlu0 %v408_v34, %s2111_s17 }
 0x178   : > { %v434_v36 = vpop.permute.xlu0 %433 }
 0x179   : > { %v436_v37 = vmul.f32 %v1983_v35, %v434_v36 }
 0x17b   : > { %438 = vrot.lane.b32.xlu1 %v436_v37, %s2111_s17 }
 0x1e9   : > { %v411_v41 = vpop.permute.xlu0 %410 }
 0x1ea   : > { %v2223_v42 = vadd.f32 %v411_v41, %v403_v39  ;;  %v1730_v39 = vld [vmem:[%s2150_s23 + $0x10] sm:$0xff] }
 0x1ec   : > { %1984 = vtanh.f32 %v2223_v42 }
 0x1ed   : > { %v439_v44 = vpop.permute.xlu1 %438 }
 0x1ee   : > { %v2226_v45 = vadd.f32 %v439_v44, %v431_v43  ;;  %v1732_v44 = vld [vmem:[%s2155_s27 + $0x28] sm:$0xff] }
 0x1f0   : > { %1986 = vtanh.f32 %v2226_v45 }
 0x1f6   : > { %v1985_v46 = vpop.eup %1984 }
 0x1f7   : > { %416 = vrot.lane.b32.xlu0 %v1985_v46, %s2112_s18 }
 0x1fa   : > { %v1987_v47 = vpop.eup %1986 }
 0x1fb   : > { %444 = vrot.lane.b32.xlu1 %v1987_v47, %s2112_s18 }
 0x269   : > { %v417_v48 = vpop.permute.xlu0 %416 }
 0x26a   : > { %v2231_v49 = vmul.f32 %v1981_v32, %v417_v48 }
 0x26c   : > { %v461_v50 = vpack.c.bf16 %v2231_v49, %v2231_v49 }
 0x26d   : > { %v445_v51 = vpop.permute.xlu1 %444 }
 0x26e   : > { %v2235_v52 = vmul.f32 %v1983_v35, %v445_v51  ;;  %463 = vrot.lane.b32.xlu0 %v461_v50, %s2111_s17 }
 0x270   : > { %v511_v53 = vpack.c.bf16 %v2235_v52, %v2235_v52 }
 0x272   : > { %513 = vrot.lane.b32.xlu1 %v511_v53, %s2111_s17 }
 0x2e0   : > { %v464_v54 = vpop.permute.xlu0 %463 }
 0x2e1   : > { %1847 = vmatmul.mubr.msk.bf16.vlgmr.msra.gmra.mrb[4].mxu0 %vm288_vm2, %v464_v54 }
 0x2e2   : > { %1859 = vmatpush3.bf16.msra.mxu0 %v2170_v1  ;;  %1862 = vmatprep.mubr.msk.bf16.mxu0 %vm2110_vm1, %v2109_v2 }
 0x2e3   : > { %1860 = vmatprep.subr.bf16.mxu0 %v2109_v2 }
 0x2e4   : > { %v514_v55 = vpop.permute.xlu1 %513 }
 0x2e5   : > { %1855 = vmatmul.mubr.msk.bf16.vlgmr.msra.gmra.mrb[4].mxu1 %vm288_vm2, %v514_v55 }
 0x2e6   : > { %1867 = vmatpush3.bf16.msra.mxu1 %v2177_v3  ;;  %1861 = vmatpush3.bf16.msra.mxu0 %v2183_v4 }
 0x2e7   : > { %1868 = vmatprep.subr.bf16.mxu1 %v2109_v2  ;;  %1870 = vmatprep.mubr.msk.bf16.mxu1 %vm2110_vm1, %v2109_v2 }
 0x2e8   : > { %1874 = vmatprep.subr.bf16.mxu0 %v2109_v2 }
 0x2ea   : > { %1869 = vmatpush3.bf16.msra.mxu1 %v2192_v5 }
 0x2eb   : > { %1882 = vmatprep.subr.bf16.mxu1 %v2109_v2 }
 0x3b4   : > { %v502_v57 = vpop.f32.mrb[4].mxu0 }
 0x3b5   : > { %v508_v58 = vadd.f32 %v1722_v56, %v502_v57  ;;  %v1848_v59 = vpop.f32.mrb[5].mxu0 }
 0x3b6   : > { %v505_v60 = vpop.f32.mrb[6].mxu0 }
 0x3b7   : > { %1988 = vtanh.f32 %v508_v58  ;;  %v1849_v62 = vpop.f32.mrb[7].mxu0  ;;  %v1726_v11 = vmul.f32 -1.442695, %v508_v58 }
 0x3b8   : > { %v552_v63 = vpop.f32.mrb[4].mxu1 }
 0x3b9   : > { %v558_v0 = vadd.f32 %v1724_v61, %v552_v63  ;;  %v1856_v6 = vpop.f32.mrb[5].mxu1 }
 0x3ba   : > { %v555_v7 = vpop.f32.mrb[6].mxu1 }
 0x3bb   : > { %1990 = vtanh.f32 %v558_v0  ;;  %v1857_v8 = vpop.f32.mrb[7].mxu1  ;;  %v1727_v12 = vmul.f32 -1.442695, %v558_v0 }
 0x3bc   : > { %1992 = vpow2.f32 %v1726_v11 }
 0x3bd   : > { %1994 = vpow2.f32 %v1727_v12 }
 0x3c1   : > { %v1989_v9 = vpop.eup %1988 }
 0x3c2   : > { %568 = vrot.lane.b32.xlu0 %v1989_v9, %s2112_s18 }
 0x3c5   : > { %v1991_v10 = vpop.eup %1990 }
 0x3c6   : > { %592 = vrot.lane.b32.xlu1 %v1991_v10, %s2112_s18  ;;  %v1993_v13 = vpop.eup %1992 }
 0x3c7   : > { %v562_v14 = vadd.f32 1.0, %v1993_v13  ;;  %v1995_v15 = vpop.eup %1994 }
 0x3c8   : > { %v586_v16 = vadd.f32 1.0, %v1995_v15 }
 0x3c9   : > { %1996 = vrcp.f32 %v562_v14 }
 0x3ca   : > { %1998 = vrcp.f32 %v586_v16 }
 0x3d3   : > { %v1997_v17 = vpop.eup %1996 }
 0x3d4   : > { %v1999_v20 = vpop.eup %1998  ;;  %v566_v23 = vmul.f32 %v1997_v17, %v2223_v42 }
 0x3d5   : > { %v590_v26 = vmul.f32 %v1999_v20, %v2226_v45 }
 0x434   : > { %v569_v18 = vpop.permute.xlu0 %568 }
 0x435   : > { %v571_v19 = vmul.f32 %v1997_v17, %v569_v18 }
 0x437   : > { %573 = vrot.lane.b32.xlu0 %v571_v19, %s2111_s17 }
 0x438   : > { %v593_v21 = vpop.permute.xlu1 %592 }
 0x439   : > { %v595_v22 = vmul.f32 %v1999_v20, %v593_v21 }
 0x43b   : > { %597 = vrot.lane.b32.xlu1 %v595_v22, %s2111_s17 }
 0x4a9   : > { %v574_v24 = vpop.permute.xlu0 %573 }
 0x4aa   : > { %v2262_v25 = vadd.f32 %v574_v24, %v566_v23  ;;  %v1738_v24 = vld [vmem:[%s2150_s23 + $0x18] sm:$0xff] }
 0x4ac   : > { %2000 = vtanh.f32 %v2262_v25 }
 0x4ad   : > { %v598_v27 = vpop.permute.xlu1 %597 }
 0x4ae   : > { %v2266_v28 = vadd.f32 %v598_v27, %v590_v26 }
 0x4b0   : > { %2002 = vtanh.f32 %v2266_v28 }
 0x4b6   : > { %v2001_v29 = vpop.eup %2000 }
 0x4b7   : > { %579 = vrot.lane.b32.xlu0 %v2001_v29, %s2112_s18  ;;  %v1740_v29 = vld [vmem:[%s2155_s27 + $0x20] sm:$0xff] }
 0x4ba   : > { %v2003_v30 = vpop.eup %2002 }
 0x4bb   : > { %603 = vrot.lane.b32.xlu1 %v2003_v30, %s2112_s18 }
 0x529   : > { %v580_v31 = vpop.permute.xlu0 %579 }
 0x52a   : > { %v2271_v32 = vmul.f32 %v1997_v17, %v580_v31 }
 0x52c   : > { %v621_v33 = vpack.c.bf16 %v2271_v32, %v2271_v32 }
 0x52d   : > { %v604_v34 = vpop.permute.xlu1 %603 }
 0x52e   : > { %v2275_v35 = vmul.f32 %v1999_v20, %v604_v34  ;;  %623 = vrot.lane.b32.xlu0 %v621_v33, %s2111_s17 }
 0x530   : > { %v671_v36 = vpack.c.bf16 %v2275_v35, %v2275_v35 }
 0x532   : > { %673 = vrot.lane.b32.xlu1 %v671_v36, %s2111_s17 }
 0x5a0   : > { %v624_v37 = vpop.permute.xlu0 %623 }
 0x5a1   : > { %1863 = vmatmul.mubr.msk.bf16.vlgmr.msra.gmra.mrb[8].mxu0 %vm288_vm2, %v624_v37 }
 0x5a2   : > { %1875 = vmatpush3.bf16.msra.mxu0 %v2170_v1  ;;  %1878 = vmatprep.mubr.msk.bf16.mxu0 %vm2110_vm1, %v2109_v2 }
 0x5a3   : > { %1876 = vmatprep.subr.bf16.mxu0 %v2109_v2 }
 0x5a4   : > { %v674_v38 = vpop.permute.xlu1 %673 }
 0x5a5   : > { %1871 = vmatmul.mubr.msk.bf16.vlgmr.msra.gmra.mrb[8].mxu1 %vm288_vm2, %v674_v38 }
 0x5a6   : > { %1883 = vmatpush3.bf16.msra.mxu1 %v2177_v3  ;;  %1877 = vmatpush3.bf16.msra.mxu0 %v2183_v4 }
 0x5a7   : > { %1884 = vmatprep.subr.bf16.mxu1 %v2109_v2  ;;  %1886 = vmatprep.mubr.msk.bf16.mxu1 %vm2110_vm1, %v2109_v2 }
 0x5a8   : > { %1890 = vmatprep.subr.bf16.mxu0 %v2109_v2 }
 0x5aa   : > { %1885 = vmatpush3.bf16.msra.mxu1 %v2192_v5 }
 0x5ab   : > { %1898 = vmatprep.subr.bf16.mxu1 %v2109_v2 }
 0x674   : > { %v662_v40 = vpop.f32.mrb[8].mxu0 }
 0x675   : > { %v668_v41 = vadd.f32 %v1730_v39, %v662_v40  ;;  %v1864_v42 = vpop.f32.mrb[9].mxu0 }
 0x676   : > { %v665_v43 = vpop.f32.mrb[10].mxu0 }
 0x677   : > { %2004 = vtanh.f32 %v668_v41  ;;  %v1865_v45 = vpop.f32.mrb[11].mxu0  ;;  %v1734_v55 = vmul.f32 -1.442695, %v668_v41 }
 0x678   : > { %v712_v46 = vpop.f32.mrb[8].mxu1 }
 0x679   : > { %v718_v47 = vadd.f32 %v1732_v44, %v712_v46  ;;  %v1872_v48 = vpop.f32.mrb[9].mxu1 }
 0x67a   : > { %v715_v50 = vpop.f32.mrb[10].mxu1 }
 0x67b   : > { %2006 = vtanh.f32 %v718_v47  ;;  %v1873_v51 = vpop.f32.mrb[11].mxu1  ;;  %v1735_v56 = vmul.f32 -1.442695, %v718_v47 }
 0x67c   : > { %2008 = vpow2.f32 %v1734_v55 }
 0x67d   : > { %2010 = vpow2.f32 %v1735_v56 }
 0x681   : > { %v2005_v53 = vpop.eup %2004 }
 0x682   : > { %728 = vrot.lane.b32.xlu0 %v2005_v53, %s2112_s18 }
 0x685   : > { %v2007_v54 = vpop.eup %2006 }
 0x686   : > { %752 = vrot.lane.b32.xlu1 %v2007_v54, %s2112_s18  ;;  %v2009_v57 = vpop.eup %2008 }
 0x687   : > { %v722_v58 = vadd.f32 1.0, %v2009_v57  ;;  %v2011_v59 = vpop.eup %2010 }
 0x688   : > { %v746_v60 = vadd.f32 1.0, %v2011_v59 }
 0x689   : > { %2012 = vrcp.f32 %v722_v58 }
 0x68a   : > { %2014 = vrcp.f32 %v746_v60 }
 0x693   : > { %v2013_v61 = vpop.eup %2012 }
 0x694   : > { %v2015_v0 = vpop.eup %2014  ;;  %v726_v8 = vmul.f32 %v2013_v61, %v2262_v25 }
 0x695   : > { %v750_v11 = vmul.f32 %v2015_v0, %v2266_v28 }
 0x6f4   : > { %v729_v62 = vpop.permute.xlu0 %728 }
 0x6f5   : > { %v731_v63 = vmul.f32 %v2013_v61, %v729_v62 }
 0x6f7   : > { %733 = vrot.lane.b32.xlu0 %v731_v63, %s2111_s17 }
 0x6f8   : > { %v753_v6 = vpop.permute.xlu1 %752 }
 0x6f9   : > { %v755_v7 = vmul.f32 %v2015_v0, %v753_v6 }
 0x6fb   : > { %757 = vrot.lane.b32.xlu1 %v755_v7, %s2111_s17 }
 0x769   : > { %v734_v9 = vpop.permute.xlu0 %733 }
 0x76a   : > { %v2302_v10 = vadd.f32 %v734_v9, %v726_v8 }
 0x76c   : > { %2016 = vtanh.f32 %v2302_v10 }
 0x76d   : > { %v758_v12 = vpop.permute.xlu1 %757 }
 0x76e   : > { %v2306_v13 = vadd.f32 %v758_v12, %v750_v11  ;;  %v1746_v11 = vld [vmem:[%s2150_s23 + $0x20] sm:$0xff] }
 0x770   : > { %2018 = vtanh.f32 %v2306_v13 }
 0x776   : > { %v2017_v14 = vpop.eup %2016 }
 0x777   : > { %739 = vrot.lane.b32.xlu0 %v2017_v14, %s2112_s18 }
 0x77a   : > { %v2019_v15 = vpop.eup %2018 }
 0x77b   : > { %763 = vrot.lane.b32.xlu1 %v2019_v15, %s2112_s18 }
 0x7e9   : > { %v740_v16 = vpop.permute.xlu0 %739 }
 0x7ea   : > { %v2311_v17 = vmul.f32 %v2013_v61, %v740_v16  ;;  %v1748_v16 = vld [vmem:[%s2155_s27 + $0x18] sm:$0xff] }
 0x7ec   : > { %v781_v18 = vpack.c.bf16 %v2311_v17, %v2311_v17 }
 0x7ed   : > { %v764_v19 = vpop.permute.xlu1 %763 }
 0x7ee   : > { %v2315_v20 = vmul.f32 %v2015_v0, %v764_v19  ;;  %783 = vrot.lane.b32.xlu0 %v781_v18, %s2111_s17 }
 0x7f0   : > { %v831_v21 = vpack.c.bf16 %v2315_v20, %v2315_v20 }
 0x7f2   : > { %833 = vrot.lane.b32.xlu1 %v831_v21, %s2111_s17 }
 0x860   : > { %v784_v22 = vpop.permute.xlu0 %783 }
 0x861   : > { %1879 = vmatmul.mubr.msk.bf16.vlgmr.msra.gmra.mrb[12].mxu0 %vm288_vm2, %v784_v22 }
 0x862   : > { %1891 = vmatpush3.bf16.msra.mxu0 %v2170_v1  ;;  %1894 = vmatprep.mubr.msk.bf16.mxu0 %vm2110_vm1, %v2109_v2 }
 0x863   : > { %1892 = vmatprep.subr.bf16.mxu0 %v2109_v2 }
 0x864   : > { %v834_v23 = vpop.permute.xlu1 %833 }
 0x865   : > { %1887 = vmatmul.mubr.msk.bf16.vlgmr.msra.gmra.mrb[12].mxu1 %vm288_vm2, %v834_v23 }
 0x866   : > { %1899 = vmatpush3.bf16.msra.mxu1 %v2177_v3  ;;  %1893 = vmatpush3.bf16.msra.mxu0 %v2183_v4 }
 0x867   : > { %1900 = vmatprep.subr.bf16.mxu1 %v2109_v2  ;;  %1902 = vmatprep.mubr.msk.bf16.mxu1 %vm2110_vm1, %v2109_v2 }
 0x868   : > { %1906 = vmatprep.subr.bf16.mxu0 %v2109_v2 }
 0x86a   : > { %1901 = vmatpush3.bf16.msra.mxu1 %v2192_v5 }
 0x86b   : > { %1914 = vmatprep.subr.bf16.mxu1 %v2109_v2 }
 0x934   : > { %v822_v25 = vpop.f32.mrb[12].mxu0 }
 0x935   : > { %v828_v26 = vadd.f32 %v1738_v24, %v822_v25  ;;  %v1880_v27 = vpop.f32.mrb[13].mxu0 }
 0x936   : > { %v825_v28 = vpop.f32.mrb[14].mxu0 }
 0x937   : > { %2020 = vtanh.f32 %v828_v26  ;;  %v1881_v30 = vpop.f32.mrb[15].mxu0  ;;  %v1742_v40 = vmul.f32 -1.442695, %v828_v26 }
 0x938   : > { %v872_v31 = vpop.f32.mrb[12].mxu1 }
 0x939   : > { %v878_v33 = vadd.f32 %v1740_v29, %v872_v31  ;;  %v1888_v34 = vpop.f32.mrb[13].mxu1 }
 0x93a   : > { %v875_v36 = vpop.f32.mrb[14].mxu1 }
 0x93b   : > { %2022 = vtanh.f32 %v878_v33  ;;  %v1889_v37 = vpop.f32.mrb[15].mxu1  ;;  %v1743_v41 = vmul.f32 -1.442695, %v878_v33 }
 0x93c   : > { %2024 = vpow2.f32 %v1742_v40 }
 0x93d   : > { %2026 = vpow2.f32 %v1743_v41 }
 0x941   : > { %v2021_v38 = vpop.eup %2020 }
 0x942   : > { %888 = vrot.lane.b32.xlu0 %v2021_v38, %s2112_s18 }
 0x945   : > { %v2023_v39 = vpop.eup %2022 }
 0x946   : > { %912 = vrot.lane.b32.xlu1 %v2023_v39, %s2112_s18  ;;  %v2025_v42 = vpop.eup %2024 }
 0x947   : > { %v882_v43 = vadd.f32 1.0, %v2025_v42  ;;  %v2027_v44 = vpop.eup %2026 }
 0x948   : > { %v906_v45 = vadd.f32 1.0, %v2027_v44 }
 0x949   : > { %2028 = vrcp.f32 %v882_v43 }
 0x94a   : > { %2030 = vrcp.f32 %v906_v45 }
 0x953   : > { %v2029_v46 = vpop.eup %2028 }
 0x954   : > { %v2031_v50 = vpop.eup %2030  ;;  %v886_v54 = vmul.f32 %v2029_v46, %v2302_v10 }
 0x955   : > { %v910_v57 = vmul.f32 %v2031_v50, %v2306_v13 }
 0x9b4   : > { %v889_v47 = vpop.permute.xlu0 %888 }
 0x9b5   : > { %v891_v48 = vmul.f32 %v2029_v46, %v889_v47 }
 0x9b7   : > { %893 = vrot.lane.b32.xlu0 %v891_v48, %s2111_s17 }
 0x9b8   : > { %v913_v51 = vpop.permute.xlu1 %912 }
 0x9b9   : > { %v915_v53 = vmul.f32 %v2031_v50, %v913_v51 }
 0x9bb   : > { %917 = vrot.lane.b32.xlu1 %v915_v53, %s2111_s17 }
 0xa29   : > { %v894_v55 = vpop.permute.xlu0 %893 }
 0xa2a   : > { %v2342_v56 = vadd.f32 %v894_v55, %v886_v54 }
 0xa2c   : > { %2032 = vtanh.f32 %v2342_v56 }
 0xa2d   : > { %v918_v58 = vpop.permute.xlu1 %917 }
 0xa2e   : > { %v2346_v59 = vadd.f32 %v918_v58, %v910_v57 }
 0xa30   : > { %2034 = vtanh.f32 %v2346_v59 }
 0xa36   : > { %v2033_v60 = vpop.eup %2032 }
 0xa37   : > { %899 = vrot.lane.b32.xlu0 %v2033_v60, %s2112_s18 }
 0xa3a   : > { %v2035_v61 = vpop.eup %2034 }
 0xa3b   : > { %923 = vrot.lane.b32.xlu1 %v2035_v61, %s2112_s18 }
 0xaa9   : > { %v900_v62 = vpop.permute.xlu0 %899 }
 0xaaa   : > { %v2351_v63 = vmul.f32 %v2029_v46, %v900_v62 }
 0xaac   : > { %v941_v0 = vpack.c.bf16 %v2351_v63, %v2351_v63 }
 0xaad   : > { %v924_v6 = vpop.permute.xlu1 %923 }
 0xaae   : > { %v2355_v7 = vmul.f32 %v2031_v50, %v924_v6  ;;  %943 = vrot.lane.b32.xlu0 %v941_v0, %s2111_s17  ;;  %v1756_v6 = vld [vmem:[%s2155_s27 + $0x10] sm:$0xff] }
 0xab0   : > { %v991_v8 = vpack.c.bf16 %v2355_v7, %v2355_v7 }
 0xab2   : > { %993 = vrot.lane.b32.xlu1 %v991_v8, %s2111_s17 }
 0xb20   : > { %v944_v9 = vpop.permute.xlu0 %943 }
 0xb21   : > { %1895 = vmatmul.mubr.msk.bf16.vlgmr.msra.gmra.mrb[16].mxu0 %vm288_vm2, %v944_v9 }
 0xb22   : > { %1907 = vmatpush3.bf16.msra.mxu0 %v2170_v1  ;;  %1910 = vmatprep.mubr.msk.bf16.mxu0 %vm2110_vm1, %v2109_v2 }
 0xb23   : > { %1908 = vmatprep.subr.bf16.mxu0 %v2109_v2 }
 0xb24   : > { %v994_v10 = vpop.permute.xlu1 %993 }
 0xb25   : > { %1903 = vmatmul.mubr.msk.bf16.vlgmr.msra.gmra.mrb[16].mxu1 %vm288_vm2, %v994_v10 }
 0xb26   : > { %1915 = vmatpush3.bf16.msra.mxu1 %v2177_v3  ;;  %1909 = vmatpush3.bf16.msra.mxu0 %v2183_v4 }
 0xb27   : > { %1916 = vmatprep.subr.bf16.mxu1 %v2109_v2  ;;  %1918 = vmatprep.mubr.msk.bf16.mxu1 %vm2110_vm1, %v2109_v2 }
 0xb28   : > { %1922 = vmatprep.subr.bf16.mxu0 %v2109_v2 }
 0xb2a   : > { %1917 = vmatpush3.bf16.msra.mxu1 %v2192_v5 }
 0xb2b   : > { %1930 = vmatprep.subr.bf16.mxu1 %v2109_v2 }
 0xbf4   : > { %v982_v12 = vpop.f32.mrb[16].mxu0 }
 0xbf5   : > { %v988_v13 = vadd.f32 %v1746_v11, %v982_v12  ;;  %v1896_v14 = vpop.f32.mrb[17].mxu0 }
 0xbf6   : > { %v985_v15 = vpop.f32.mrb[18].mxu0 }
 0xbf7   : > { %2036 = vtanh.f32 %v988_v13  ;;  %v1897_v18 = vpop.f32.mrb[19].mxu0  ;;  %v1750_v27 = vmul.f32 -1.442695, %v988_v13 }
 0xbf8   : > { %v1032_v19 = vpop.f32.mrb[16].mxu1 }
 0xbf9   : > { %v1038_v21 = vadd.f32 %v1748_v16, %v1032_v19  ;;  %v1904_v22 = vpop.f32.mrb[17].mxu1 }
 0xbfa   : > { %v1035_v23 = vpop.f32.mrb[18].mxu1 }
 0xbfb   : > { %2038 = vtanh.f32 %v1038_v21  ;;  %v1905_v24 = vpop.f32.mrb[19].mxu1  ;;  %v1751_v28 = vmul.f32 -1.442695, %v1038_v21 }
 0xbfc   : > { %2040 = vpow2.f32 %v1750_v27 }
 0xbfd   : > { %2042 = vpow2.f32 %v1751_v28 }
 0xc01   : > { %v2037_v25 = vpop.eup %2036 }
 0xc02   : > { %1048 = vrot.lane.b32.xlu0 %v2037_v25, %s2112_s18 }
 0xc05   : > { %v2039_v26 = vpop.eup %2038 }
 0xc06   : > { %1072 = vrot.lane.b32.xlu1 %v2039_v26, %s2112_s18  ;;  %v2041_v29 = vpop.eup %2040 }
 0xc07   : > { %v1042_v30 = vadd.f32 1.0, %v2041_v29  ;;  %v2043_v31 = vpop.eup %2042 }
 0xc08   : > { %v1066_v33 = vadd.f32 1.0, %v2043_v31 }
 0xc09   : > { %2044 = vrcp.f32 %v1042_v30 }
 0xc0a   : > { %2046 = vrcp.f32 %v1066_v33 }
 0xc13   : > { %v2045_v34 = vpop.eup %2044 }
 0xc14   : > { %v2047_v38 = vpop.eup %2046  ;;  %v1046_v41 = vmul.f32 %v2045_v34, %v2342_v56 }
 0xc15   : > { %v1070_v44 = vmul.f32 %v2047_v38, %v2346_v59  ;;  %v1754_v59 = vld [vmem:[%s2150_s23 + $0x28] sm:$0xff] }
 0xc74   : > { %v1049_v36 = vpop.permute.xlu0 %1048 }
 0xc75   : > { %v1051_v37 = vmul.f32 %v2045_v34, %v1049_v36 }
 0xc77   : > { %1053 = vrot.lane.b32.xlu0 %v1051_v37, %s2111_s17 }
 0xc78   : > { %v1073_v39 = vpop.permute.xlu1 %1072 }
 0xc79   : > { %v1075_v40 = vmul.f32 %v2047_v38, %v1073_v39 }
 0xc7b   : > { %1077 = vrot.lane.b32.xlu1 %v1075_v40, %s2111_s17 }
 0xce9   : > { %v1054_v42 = vpop.permute.xlu0 %1053 }
 0xcea   : > { %v2382_v43 = vadd.f32 %v1054_v42, %v1046_v41 }
 0xcec   : > { %2048 = vtanh.f32 %v2382_v43 }
 0xced   : > { %v1078_v45 = vpop.permute.xlu1 %1077 }
 0xcee   : > { %v2386_v46 = vadd.f32 %v1078_v45, %v1070_v44 }
 0xcf0   : > { %2050 = vtanh.f32 %v2386_v46 }
 0xcf6   : > { %v2049_v47 = vpop.eup %2048 }
 0xcf7   : > { %1059 = vrot.lane.b32.xlu0 %v2049_v47, %s2112_s18 }
 0xcfa   : > { %v2051_v48 = vpop.eup %2050 }
 0xcfb   : > { %1083 = vrot.lane.b32.xlu1 %v2051_v48, %s2112_s18 }
 0xd69   : > { %v1060_v50 = vpop.permute.xlu0 %1059 }
 0xd6a   : > { %v2391_v51 = vmul.f32 %v2045_v34, %v1060_v50 }
 0xd6c   : > { %v1101_v53 = vpack.c.bf16 %v2391_v51, %v2391_v51 }
 0xd6d   : > { %v1084_v54 = vpop.permute.xlu1 %1083 }
 0xd6e   : > { %v2395_v55 = vmul.f32 %v2047_v38, %v1084_v54  ;;  %1103 = vrot.lane.b32.xlu0 %v1101_v53, %s2111_s17 }
 0xd70   : > { %v1151_v56 = vpack.c.bf16 %v2395_v55, %v2395_v55 }
 0xd72   : > { %1153 = vrot.lane.b32.xlu1 %v1151_v56, %s2111_s17  ;;  %v1764_v56 = vld [vmem:[%s2155_s27 + $0x8] sm:$0xff] }
 0xde0   : > { %v1104_v57 = vpop.permute.xlu0 %1103 }
 0xde1   : > { %1911 = vmatmul.mubr.msk.bf16.vlgmr.msra.gmra.mrb[20].mxu0 %vm288_vm2, %v1104_v57 }
 0xde2   : > { %1923 = vmatpush3.bf16.msra.mxu0 %v2170_v1  ;;  %1926 = vmatprep.mubr.msk.bf16.mxu0 %vm2110_vm1, %v2109_v2 }
 0xde3   : > { %1924 = vmatprep.subr.bf16.mxu0 %v2109_v2 }
 0xde4   : > { %v1154_v58 = vpop.permute.xlu1 %1153 }
 0xde5   : > { %1919 = vmatmul.mubr.msk.bf16.vlgmr.msra.gmra.mrb[20].mxu1 %vm288_vm2, %v1154_v58 }
 0xde6   : > { %1931 = vmatpush3.bf16.msra.mxu1 %v2177_v3  ;;  %1925 = vmatpush3.bf16.msra.mxu0 %v2183_v4 }
 0xde7   : > { %1932 = vmatprep.subr.bf16.mxu1 %v2109_v2  ;;  %1934 = vmatprep.mubr.msk.bf16.mxu1 %vm2110_vm1, %v2109_v2 }
 0xde8   : > { %1938 = vmatprep.subr.bf16.mxu0 %v2109_v2 }
 0xdea   : > { %1933 = vmatpush3.bf16.msra.mxu1 %v2192_v5 }
 0xdeb   : > { %1946 = vmatprep.subr.bf16.mxu1 %v2109_v2 }
 0xeb4   : > { %v1142_v60 = vpop.f32.mrb[20].mxu0 }
 0xeb5   : > { %v1148_v61 = vadd.f32 %v1754_v59, %v1142_v60  ;;  %v1912_v62 = vpop.f32.mrb[21].mxu0 }
 0xeb6   : > { %v1145_v0 = vpop.f32.mrb[22].mxu0 }
 0xeb7   : > { %2052 = vtanh.f32 %v1148_v61  ;;  %v1913_v8 = vpop.f32.mrb[23].mxu0  ;;  %v1758_v16 = vmul.f32 -1.442695, %v1148_v61 }
 0xeb8   : > { %v1192_v9 = vpop.f32.mrb[20].mxu1 }
 0xeb9   : > { %v1198_v10 = vadd.f32 %v1756_v6, %v1192_v9  ;;  %v1920_v11 = vpop.f32.mrb[21].mxu1 }
 0xeba   : > { %v1195_v12 = vpop.f32.mrb[22].mxu1 }
 0xebb   : > { %2054 = vtanh.f32 %v1198_v10  ;;  %v1921_v13 = vpop.f32.mrb[23].mxu1  ;;  %v1759_v18 = vmul.f32 -1.442695, %v1198_v10 }
 0xebc   : > { %2056 = vpow2.f32 %v1758_v16 }
 0xebd   : > { %2058 = vpow2.f32 %v1759_v18 }
 0xec1   : > { %v2053_v14 = vpop.eup %2052 }
 0xec2   : > { %1208 = vrot.lane.b32.xlu0 %v2053_v14, %s2112_s18 }
 0xec5   : > { %v2055_v15 = vpop.eup %2054 }
 0xec6   : > { %1232 = vrot.lane.b32.xlu1 %v2055_v15, %s2112_s18  ;;  %v2057_v19 = vpop.eup %2056 }
 0xec7   : > { %v1202_v21 = vadd.f32 1.0, %v2057_v19  ;;  %v2059_v22 = vpop.eup %2058 }
 0xec8   : > { %v1226_v23 = vadd.f32 1.0, %v2059_v22 }
 0xec9   : > { %2060 = vrcp.f32 %v1202_v21 }
 0xeca   : > { %2062 = vrcp.f32 %v1226_v23 }
 0xed3   : > { %v2061_v24 = vpop.eup %2060 }
 0xed4   : > { %v2063_v27 = vpop.eup %2062  ;;  %v1206_v30 = vmul.f32 %v2061_v24, %v2382_v43 }
 0xed5   : > { %v1230_v34 = vmul.f32 %v2063_v27, %v2386_v46 }
 0xf34   : > { %v1209_v25 = vpop.permute.xlu0 %1208 }
 0xf35   : > { %v1211_v26 = vmul.f32 %v2061_v24, %v1209_v25 }
 0xf37   : > { %1213 = vrot.lane.b32.xlu0 %v1211_v26, %s2111_s17 }
 0xf38   : > { %v1233_v28 = vpop.permute.xlu1 %1232 }
 0xf39   : > { %v1235_v29 = vmul.f32 %v2063_v27, %v1233_v28 }
 0xf3b   : > { %1237 = vrot.lane.b32.xlu1 %v1235_v29, %s2111_s17 }
 0xfa9   : > { %v1214_v31 = vpop.permute.xlu0 %1213 }
 0xfaa   : > { %v2422_v33 = vadd.f32 %v1214_v31, %v1206_v30 }
 0xfac   : > { %2064 = vtanh.f32 %v2422_v33 }
 0xfad   : > { %v1238_v36 = vpop.permute.xlu1 %1237 }
 0xfae   : > { %v2426_v37 = vadd.f32 %v1238_v36, %v1230_v34  ;;  %v1770_v36 = vld [vmem:[%s2150_s23 + $0x38] sm:$0xff] }
 0xfb0   : > { %2066 = vtanh.f32 %v2426_v37 }
 0xfb6   : > { %v2065_v38 = vpop.eup %2064 }
 0xfb7   : > { %1219 = vrot.lane.b32.xlu0 %v2065_v38, %s2112_s18 }
 0xfba   : > { %v2067_v39 = vpop.eup %2066 }
 0xfbb   : > { %1243 = vrot.lane.b32.xlu1 %v2067_v39, %s2112_s18 }
0x1029   : > { %v1220_v40 = vpop.permute.xlu0 %1219 }
0x102a   : > { %v2431_v41 = vmul.f32 %v2061_v24, %v1220_v40 }
0x102c   : > { %v1261_v42 = vpack.c.bf16 %v2431_v41, %v2431_v41 }
0x102d   : > { %v1244_v43 = vpop.permute.xlu1 %1243 }
0x102e   : > { %v2435_v44 = vmul.f32 %v2063_v27, %v1244_v43  ;;  %1263 = vrot.lane.b32.xlu0 %v1261_v42, %s2111_s17  ;;  %v1469_v42 = vld [vmem:[%s2155_s27] sm:$0xff] }
0x1030   : > { %v1311_v45 = vpack.c.bf16 %v2435_v44, %v2435_v44 }
0x1032   : > { %1313 = vrot.lane.b32.xlu1 %v1311_v45, %s2111_s17 }
0x10a0   : > { %v1264_v46 = vpop.permute.xlu0 %1263 }
0x10a1   : > { %1927 = vmatmul.mubr.msk.bf16.vlgmr.msra.gmra.mrb[24].mxu0 %vm288_vm2, %v1264_v46 }
0x10a2   : > { %1939 = vmatpush3.bf16.msra.mxu0 %v2170_v1  ;;  %1942 = vmatprep.mubr.msk.bf16.mxu0 %vm2110_vm1, %v2109_v2  ;;  %v1762_v1 = vld [vmem:[%s2150_s23 + $0x30] sm:$0xff] }
0x10a3   : > { %1940 = vmatprep.subr.bf16.mxu0 %v2109_v2 }
0x10a4   : > { %v1314_v47 = vpop.permute.xlu1 %1313 }
0x10a5   : > { %1935 = vmatmul.mubr.msk.bf16.vlgmr.msra.gmra.mrb[24].mxu1 %vm288_vm2, %v1314_v47 }
0x10a6   : > { %1947 = vmatpush3.bf16.msra.mxu1 %v2177_v3  ;;  %1941 = vmatpush3.bf16.msra.mxu0 %v2183_v4 }
0x10a7   : > { %1948 = vmatprep.subr.bf16.mxu1 %v2109_v2  ;;  %1950 = vmatprep.mubr.msk.bf16.mxu1 %vm2110_vm1, %v2109_v2 }
0x10aa   : > { %1949 = vmatpush3.bf16.msra.mxu1 %v2192_v5 }
0x1174   : > { %v1302_v48 = vpop.f32.mrb[24].mxu0 }
0x1175   : > { %v1308_v50 = vadd.f32 %v1762_v1, %v1302_v48  ;;  %v1928_v53 = vpop.f32.mrb[25].mxu0 }
0x1176   : > { %v1305_v54 = vpop.f32.mrb[26].mxu0 }
0x1177   : > { %2068 = vtanh.f32 %v1308_v50  ;;  %v1929_v57 = vpop.f32.mrb[27].mxu0  ;;  %v1766_v5 = vmul.f32 -1.442695, %v1308_v50 }
0x1178   : > { %v1352_v58 = vpop.f32.mrb[24].mxu1 }
0x1179   : > { %v1358_v59 = vadd.f32 %v1764_v56, %v1352_v58  ;;  %v1936_v3 = vpop.f32.mrb[25].mxu1 }
0x117a   : > { %v1355_v60 = vpop.f32.mrb[26].mxu1 }
0x117b   : > { %2070 = vtanh.f32 %v1358_v59  ;;  %v1937_v4 = vpop.f32.mrb[27].mxu1  ;;  %v1767_v62 = vmul.f32 -1.442695, %v1358_v59 }
0x117c   : > { %2072 = vpow2.f32 %v1766_v5 }
0x117d   : > { %2074 = vpow2.f32 %v1767_v62 }
0x1181   : > { %v2069_v61 = vpop.eup %2068 }
0x1182   : > { %1368 = vrot.lane.b32.xlu0 %v2069_v61, %s2112_s18 }
0x1185   : > { %v2071_v2 = vpop.eup %2070 }
0x1186   : > { %1392 = vrot.lane.b32.xlu1 %v2071_v2, %s2112_s18  ;;  %v2073_v0 = vpop.eup %2072 }
0x1187   : > { %v1362_v6 = vadd.f32 1.0, %v2073_v0  ;;  %v2075_v8 = vpop.eup %2074 }
0x1188   : > { %v1386_v9 = vadd.f32 1.0, %v2075_v8 }
0x1189   : > { %2076 = vrcp.f32 %v1362_v6 }
0x118a   : > { %2078 = vrcp.f32 %v1386_v9 }
0x1193   : > { %v2077_v10 = vpop.eup %2076 }
0x1194   : > { %v2079_v13 = vpop.eup %2078  ;;  %v1366_v16 = vmul.f32 %v2077_v10, %v2422_v33 }
0x1195   : > { %v1390_v21 = vmul.f32 %v2079_v13, %v2426_v37 }
0x11f4   : > { %v1369_v11 = vpop.permute.xlu0 %1368 }
0x11f5   : > { %v1371_v12 = vmul.f32 %v2077_v10, %v1369_v11 }
0x11f7   : > { %1373 = vrot.lane.b32.xlu0 %v1371_v12, %s2111_s17 }
0x11f8   : > { %v1393_v14 = vpop.permute.xlu1 %1392 }
0x11f9   : > { %v1395_v15 = vmul.f32 %v2079_v13, %v1393_v14 }
0x11fb   : > { %1397 = vrot.lane.b32.xlu1 %v1395_v15, %s2111_s17 }
0x1269   : > { %v1374_v18 = vpop.permute.xlu0 %1373 }
0x126a   : > { %v1376_v19 = vadd.f32 %v1374_v18, %v1366_v16 }
0x126c   : > { %2080 = vtanh.f32 %v1376_v19 }
0x126d   : > { %v1398_v22 = vpop.permute.xlu1 %1397 }
0x126e   : > { %v1400_v23 = vadd.f32 %v1398_v22, %v1390_v21 }
0x1270   : > { %2082 = vtanh.f32 %v1400_v23 }
0x1276   : > { %v2081_v24 = vpop.eup %2080 }
0x1277   : > { %1379 = vrot.lane.b32.xlu0 %v2081_v24, %s2112_s18 }
0x127a   : > { %v2083_v25 = vpop.eup %2082 }
0x127b   : > { %1403 = vrot.lane.b32.xlu1 %v2083_v25, %s2112_s18 }
0x12e9   : > { %v1380_v26 = vpop.permute.xlu0 %1379 }
0x12ea   : > { %v2463_v27 = vmul.f32 %v2077_v10, %v1380_v26 }
0x12ec   : > { %v1421_v28 = vpack.c.bf16 %v2463_v27, %v2463_v27 }
0x12ed   : > { %v1404_v29 = vpop.permute.xlu1 %1403 }
0x12ee   : > { %v2467_v30 = vmul.f32 %v2079_v13, %v1404_v29  ;;  %1423 = vrot.lane.b32.xlu0 %v1421_v28, %s2111_s17 }
0x12f0   : > { %v1470_v31 = vpack.c.bf16 %v2467_v30, %v2467_v30 }
0x12f2   : > { %1472 = vrot.lane.b32.xlu1 %v1470_v31, %s2111_s17 }
0x1360   : > { %v1424_v33 = vpop.permute.xlu0 %1423 }
0x1361   : > { %1943 = vmatmul.mubr.msk.bf16.vlgmr.msra.gmra.mrb[28].mxu0 %vm288_vm2, %v1424_v33 }
0x1364   : > { %v1473_v34 = vpop.permute.xlu1 %1472 }
0x1365   : > { %1951 = vmatmul.mubr.msk.bf16.vlgmr.msra.gmra.mrb[28].mxu1 %vm288_vm2, %v1473_v34 }
0x1434   : > { %v1462_v37 = vpop.f32.mrb[28].mxu0 }
0x1435   : > { %v1468_v38 = vadd.f32 %v1770_v36, %v1462_v37  ;;  %v1944_v39 = vpop.f32.mrb[29].mxu0 }
0x1436   : > { %v1465_v40 = vpop.f32.mrb[30].mxu0 }
0x1437   : > { %2084 = vtanh.f32 %v1468_v38  ;;  %v1945_v43 = vpop.f32.mrb[31].mxu0  ;;  %v1773_v54 = vmul.f32 -1.442695, %v1468_v38 }
0x1438   : > { %v1511_v45 = vpop.f32.mrb[28].mxu1 }
0x1439   : > { %v1517_v46 = vadd.f32 %v1511_v45, %v1469_v42  ;;  %v1952_v47 = vpop.f32.mrb[29].mxu1 }
0x143a   : > { %v1514_v1 = vpop.f32.mrb[30].mxu1 }
0x143b   : > { %2086 = vtanh.f32 %v1517_v46  ;;  %v1953_v48 = vpop.f32.mrb[31].mxu1  ;;  %v1774_v56 = vmul.f32 -1.442695, %v1517_v46 }
0x143c   : > { %2088 = vpow2.f32 %v1773_v54 }
0x143d   : > { %2090 = vpow2.f32 %v1774_v56 }
0x1441   : > { %v2085_v50 = vpop.eup %2084 }
0x1442   : > { %1527 = vrot.lane.b32.xlu0 %v2085_v50, %s2112_s18 }
0x1445   : > { %v2087_v53 = vpop.eup %2086 }
0x1446   : > { %1551 = vrot.lane.b32.xlu1 %v2087_v53, %s2112_s18  ;;  %v2089_v57 = vpop.eup %2088 }
0x1447   : > { %v1521_v58 = vadd.f32 1.0, %v2089_v57  ;;  %v2091_v59 = vpop.eup %2090 }
0x1448   : > { %v1545_v3 = vadd.f32 1.0, %v2091_v59 }
0x1449   : > { %2092 = vrcp.f32 %v1521_v58 }
0x144a   : > { %2094 = vrcp.f32 %v1545_v3 }
0x1453   : > { %v2093_v60 = vpop.eup %2092 }
0x1454   : > { %v2095_v2 = vpop.eup %2094  ;;  %v1525_v0 = vmul.f32 %v2093_v60, %v1376_v19 }
0x1455   : > { %v1549_v9 = vmul.f32 %v2095_v2, %v1400_v23 }
0x14b4   : > { %v1528_v4 = vpop.permute.xlu0 %1527 }
0x14b5   : > { %v1530_v61 = vmul.f32 %v2093_v60, %v1528_v4 }
0x14b7   : > { %1532 = vrot.lane.b32.xlu0 %v1530_v61, %s2111_s17 }
0x14b8   : > { %v1552_v5 = vpop.permute.xlu1 %1551 }
0x14b9   : > { %v1554_v62 = vmul.f32 %v2095_v2, %v1552_v5 }
0x14bb   : > { %1556 = vrot.lane.b32.xlu1 %v1554_v62, %s2111_s17 }
0x1529   : > { %v1533_v6 = vpop.permute.xlu0 %1532 }
0x152a   : > { %v1535_v8 = vadd.f32 %v1533_v6, %v1525_v0 }
0x152c   : > { %2096 = vtanh.f32 %v1535_v8 }
0x152d   : > { %v1557_v10 = vpop.permute.xlu1 %1556 }
0x152e   : > { %v1559_v11 = vadd.f32 %v1557_v10, %v1549_v9 }
0x1530   : > { %2098 = vtanh.f32 %v1559_v11 }
0x1536   : > { %v2097_v12 = vpop.eup %2096 }
0x1537   : > { %1538 = vrot.lane.b32.xlu0 %v2097_v12, %s2112_s18 }
0x153a   : > { %v2099_v13 = vpop.eup %2098 }
0x153b   : > { %1562 = vrot.lane.b32.xlu1 %v2099_v13, %s2112_s18  ;;  %449 = vrot.lane.b32.xlu0 %v2231_v49, %s2111_s17 }
0x153f   : > { %454 = vrot.lane.b32.xlu1 %v2235_v52, %s2111_s17  ;;  %608 = vrot.lane.b32.xlu0 %v2271_v32, %s2111_s17 }
0x1543   : > { %614 = vrot.lane.b32.xlu1 %v2275_v35, %s2111_s17  ;;  %768 = vrot.lane.b32.xlu0 %v2311_v17, %s2111_s17 }
0x1547   : > { %774 = vrot.lane.b32.xlu1 %v2315_v20, %s2111_s17  ;;  %928 = vrot.lane.b32.xlu0 %v2351_v63, %s2111_s17 }
0x154b   : > { %934 = vrot.lane.b32.xlu1 %v2355_v7, %s2111_s17  ;;  %1088 = vrot.lane.b32.xlu0 %v2391_v51, %s2111_s17 }
0x154f   : > { %1094 = vrot.lane.b32.xlu1 %v2395_v55, %s2111_s17  ;;  %1248 = vrot.lane.b32.xlu0 %v2431_v41, %s2111_s17 }
0x1553   : > { %1254 = vrot.lane.b32.xlu1 %v2435_v44, %s2111_s17  ;;  %1408 = vrot.lane.b32.xlu0 %v2463_v27, %s2111_s17 }
0x1557   : > { %1414 = vrot.lane.b32.xlu1 %v2467_v30, %s2111_s17 }
0x15a9   : > { %v1539_v49 = vpop.permute.xlu0 %1538 }
0x15aa   : > { %v1541_v52 = vmul.f32 %v2093_v60, %v1539_v49 }
0x15ac   : > { %1567 = vrot.lane.b32.xlu0 %v1541_v52, %s2111_s17 }
0x15ad   : > { %v1563_v32 = vpop.permute.xlu1 %1562  ;;  %v450_v35 = vpop.permute.xlu0 %449 }
0x15ae   : > { %v1565_v17 = vmul.f32 %v2095_v2, %v1563_v32  ;;  %452 = vst.msk [vmem:[%s2160_s30] sm:$0xff] %vm288_vm2, %v450_v35 }
0x15b0   : > { %1573 = vrot.lane.b32.xlu1 %v1565_v17, %s2111_s17  ;;  %1579 = vrot.lane.b32.xlu0 %v1535_v8, %s2113_s19 }
0x15b1   : > { %v455_v20 = vpop.permute.xlu1 %454  ;;  %v609_v63 = vpop.permute.xlu0 %608 }
0x15b2   : > { %1721 = vst.msk [vmem:[%s2165_s7 + $0x38] sm:$0xff] %vm288_vm2, %v455_v20  ;;  %1728 = vst.msk [vmem:[%s2160_s30 + $0x8] sm:$0xff] %vm288_vm2, %v609_v63 }
0x15b4   : > { %1585 = vrot.lane.b32.xlu1 %v1559_v11, %s2113_s19 }
0x15b5   : > { %v615_v7 = vpop.permute.xlu1 %614  ;;  %v769_v51 = vpop.permute.xlu0 %768 }
0x15b6   : > { %1729 = vst.msk [vmem:[%s2165_s7 + $0x30] sm:$0xff] %vm288_vm2, %v615_v7  ;;  %1736 = vst.msk [vmem:[%s2160_s30 + $0x10] sm:$0xff] %vm288_vm2, %v769_v51 }
0x15b9   : > { %v775_v55 = vpop.permute.xlu1 %774  ;;  %v929_v41 = vpop.permute.xlu0 %928 }
0x15ba   : > { %1737 = vst.msk [vmem:[%s2165_s7 + $0x28] sm:$0xff] %vm288_vm2, %v775_v55  ;;  %1744 = vst.msk [vmem:[%s2160_s30 + $0x18] sm:$0xff] %vm288_vm2, %v929_v41 }
0x15bd   : > { %v935_v44 = vpop.permute.xlu1 %934  ;;  %v1089_v14 = vpop.permute.xlu0 %1088 }
0x15be   : > { %1745 = vst.msk [vmem:[%s2165_s7 + $0x20] sm:$0xff] %vm288_vm2, %v935_v44  ;;  %1752 = vst.msk [vmem:[%s2160_s30 + $0x20] sm:$0xff] %vm288_vm2, %v1089_v14 }
0x15c1   : > { %v1095_v15 = vpop.permute.xlu1 %1094  ;;  %v1249_v16 = vpop.permute.xlu0 %1248 }
0x15c2   : > { %1753 = vst.msk [vmem:[%s2165_s7 + $0x18] sm:$0xff] %vm288_vm2, %v1095_v15  ;;  %1760 = vst.msk [vmem:[%s2160_s30 + $0x28] sm:$0xff] %vm288_vm2, %v1249_v16 }
0x15c5   : > { %v1255_v18 = vpop.permute.xlu1 %1254  ;;  %v1409_v19 = vpop.permute.xlu0 %1408 }
0x15c6   : > { %1761 = vst.msk [vmem:[%s2165_s7 + $0x10] sm:$0xff] %vm288_vm2, %v1255_v18  ;;  %1768 = vst.msk [vmem:[%s2160_s30 + $0x30] sm:$0xff] %vm288_vm2, %v1409_v19 }
0x15c9   : > { %v1415_v21 = vpop.permute.xlu1 %1414 }
0x15ca   : > { %1769 = vst.msk [vmem:[%s2165_s7 + $0x8] sm:$0xff] %vm288_vm2, %v1415_v21 }
0x161e   : > { %v1568_v22 = vpop.permute.xlu0 %1567 }
0x161f   : > { %1775 = vst.msk [vmem:[%s2160_s30 + $0x38] sm:$0xff] %vm288_vm2, %v1568_v22  ;;  %1577 = vst.msk [vmem:[#allocation2] sm:$0xff] %vm288_vm2, %v1568_v22 }
0x1622   : > { %v1574_v23 = vpop.permute.xlu1 %1573  ;;  %v1580_v24 = vpop.permute.xlu0 %1579 }
0x1623   : > { %1576 = vst.msk [vmem:[%s2165_s7] sm:$0xff] %vm288_vm2, %v1574_v23  ;;  %1583 = vst.msk [vmem:[#allocation2 + $0x8] sm:$0xff] %vm288_vm2, %v1574_v23 }
0x1624   : > { %1582 = vst.msk [vmem:[#allocation3] sm:$0xff] %vm288_vm2, %v1580_v24 }
0x1626   : > { %v1586_v25 = vpop.permute.xlu1 %1585 }
0x1627   : > { %1588 = vst.msk [vmem:[#allocation3 + $0x8] sm:$0xff] %vm288_vm2, %v1586_v25 }
0x1628 PF: > { %s15_s15 = sadd.s32 1, %s2106_s15  }
0x1629   : > { %p12_p6 = scmp.ge.s32.totalorder %s15_s15, 4  }
0x162b   :  { %14 = sbr.rel (!%p12_p6) target bundleno = 1 (0x1), region = 112 }

</bundles_post_ra>
